<compile_context>
chip_gen: v6e
topology: v6e:2x2x1
jax: 0.10.0
libtpu: 0.0.40
codegen_flags: <defaults>
</compile_context>

<pallas_src>
import functools

import jax
import jax.numpy as jnp
import numpy as np
from jax import lax
from jax.experimental import pallas as pl
from jax.experimental.pallas import tpu as pltpu


def _round_up(x, m):
    return ((x + m - 1) // m) * m


def _static_lane_roll(x, s, size):
    """y[..., p] = x[..., (p + s) % size] for a static python int shift s (last axis)."""
    k = s % size
    if k == 0:
        return x
    return jnp.concatenate([x[:, k:], x[:, :k]], axis=1)


# --------------------------------------------------------------------------------------
# Pass 1: ReLU + dilated depthwise conv + pointwise 1x1 conv fused into ONE MXU matmul,
#         plus per-block partial BatchNorm statistics.
# --------------------------------------------------------------------------------------
def fused_dilconv_kernel(x_ref, w_ref, mask_ref, y_ref, part_ref, patches,
                         *, B_blk, C_in, HW, KKC, shifts, zero_start):
    """
    x_ref   : (B_blk, C_in, HW)       flattened NCHW image block (compute dtype)
    w_ref   : (C_out, KKC_pad)        combined weight w[o, t*C_in+c] = wdw[c,t]*wpw[o,c] (pad rows = 0)
    mask_ref: (K*K, HW)               per-tap 0/1 boundary-validity masks
    y_ref   : (C_out, B_blk*HW)       conv output block (channels on sublanes, pixels on lanes)
    part_ref: (1, C_out, 2)           per-block [sum, sum_sq] over pixels (f32)
    patches : (KKC_pad, B_blk*HW)     VMEM im2col scratch (compute dtype), lane-dense
    """
    KKC_pad = patches.shape[0]
    width = patches.shape[1]

    # Zero only the contraction pad rows (real rows are fully overwritten below);
    # start is rounded down to an 8-aligned sublane offset.
    if KKC_pad > KKC:
        patches[zero_start:KKC_pad, :] = jnp.zeros(
            (KKC_pad - zero_start, width), patches.dtype)

    masks = mask_ref[...]                                     # (K*K, HW), resident

    for b in range(B_blk):                                    # static unroll over images
        xb = jnp.maximum(x_ref[b], 0)                         # ReLU, (C_in, HW), lane-dense
        for t, s in enumerate(shifts):                        # static K*K tap unroll
            shifted = _static_lane_roll(xb, s, HW)            # lane shift (XLU path)
            shifted = shifted * masks[t:t + 1, :]             # zero-pad boundary mask (VPU)
            patches[t * C_in:(t + 1) * C_in, b * HW:(b + 1) * HW] = shifted

    # One MXU matmul replaces the depthwise AND the pointwise conv (f32 accumulation):
    #   y[o, p] = sum_{t,c} w[o, t*C_in+c] * patches[t*C_in+c, p]
    y = jnp.dot(w_ref[...], patches[...], preferred_element_type=jnp.float32)
    y_ref[...] = y.astype(y_ref.dtype)

    # Per-block partial BN statistics (f32); reduced across blocks in the wrapper so the
    # batch grid axis stays "parallel".
    s1 = jnp.sum(y, axis=1, keepdims=True)                    # (C_out, 1)
    s2 = jnp.sum(y * y, axis=1, keepdims=True)                # (C_out, 1)
    part_ref[0] = jnp.concatenate([s1, s2], axis=1)           # (C_out, 2)


# --------------------------------------------------------------------------------------
# Pass 2: apply BatchNorm scale/shift; CNHW -> NCHW reorder happens via BlockSpec indexing.
# --------------------------------------------------------------------------------------
def bn_apply_kernel(y_ref, scale_ref, shift_ref, o_ref, *, B_blk, HW):
    """
    y_ref    : (C_out, B_blk*HW)   conv output block (compute dtype)
    scale_ref: (C_out, 1)          gamma * rsqrt(var + eps)           (f32)
    shift_ref: (C_out, 1)          beta - mean * gamma * rsqrt(...)   (f32)
    o_ref    : (B_blk, C_out, HW)  normalized NCHW output block (f32)
    """
    sc = scale_ref[...]
    sh = shift_ref[...]
    for b in range(B_blk):                                    # 128-aligned lane slices, no relayout
        blk = y_ref[:, b * HW:(b + 1) * HW].astype(jnp.float32)
        o_ref[b] = blk * sc + sh


# --------------------------------------------------------------------------------------
# Parameter glue (wrapper side, tiny).
# --------------------------------------------------------------------------------------
def _mix_depthwise_weight(dw_weight, weights, kernel_list, kernel_max, use_argmax):
    """Replicates DilConvMixture._compute_weight_and_bias accumulation.

    dw_weight: (C_in, 1, kmax, kmax) (PyTorch depthwise layout) -> (C_in, kmax, kmax) mixed weight.
    """
    kmax = kernel_max
    masks = []
    for k in kernel_list:
        s = (kmax - k) // 2
        masks.append(jnp.zeros((kmax, kmax), jnp.float32).at[s:s + k, s:s + k].set(1.0))
    masks = jnp.stack(masks)                                  # (n_kernels, kmax, kmax)
    w = weights.astype(jnp.float32)
    if use_argmax:
        idx = jnp.argmax(w)                                   # jit-safe (was np.argmax on traced array)
        mix = w[idx] * masks[idx]
    else:
        mix = jnp.einsum("k,kij->ij", w, masks)
    return dw_weight[:, 0, :, :].astype(jnp.float32) * mix[None, :, :]


def _pick_batch_block(N, HW, elt_bytes, kkc_pad, target_lanes=512,
                      max_scratch_bytes=8 * 1024 * 1024):
    """Images per grid step: target >=512 matmul lanes, keep the patch scratch small,
    and respect BlockSpec lane divisibility (block lane dim % 128 == 0 unless == full dim)."""
    b = min(N, max(1, target_lanes // max(HW, 1)))
    while N % b:
        b -= 1
    while b > 1 and kkc_pad * b * HW * elt_bytes > max_scratch_bytes:
        b -= 1
        while N % b:
            b -= 1
    if b != N and (b * HW) % 128 != 0:
        b = N                                                 # full-dim block is always legal
    return max(b, 1)


def _vmem_limit_bytes(per_step_bytes):
    try:
        cap = int(pltpu.get_tpu_info().vmem_capacity_bytes)   # 64 MiB on v7x, 128 MiB v5e/v6e
    except Exception:
        cap = 128 * 1024 * 1024
    budget = (cap * 3) // 4                                   # leave headroom below physical
    return int(min(budget, max(8 * 1024 * 1024, 4 * per_step_bytes)))


def dilconv_mixture_forward(x, weights, params, *, kernel_list, kernel_max,
                            dilation=2, use_argmax=False,
                            compute_dtype=jnp.float32,        # bf16 recommended on v6e/v7x
                            eps=1e-5, batch_block=None):
    # TODO(synk): stride is assumed 1 (DARTS stride-2 reduction DilConv variant not implemented).
    # TODO(synk): optional depthwise-conv bias is not implemented (DARTS DilConv uses bias=False).
    N, C_in, H, W = x.shape
    C_out = params["pw_weight"].shape[0]
    kmax = kernel_max
    dil = dilation
    pad = dil * (kmax - 1) // 2        # == get_padding(k) for k in {3,5} with dilation 2
    HW = H * W
    KK = kmax * kmax
    KKC = KK * C_in
    KKC_pad = _round_up(KKC, 128)      # full MXU contraction tiles
    elt = jnp.dtype(compute_dtype).itemsize

    # ---- combined depthwise*pointwise weight (one matmul replaces both convs) ----------
    # Note: the use_argmax=True torch branch (cropped kxk kernel + get_padding(k)) is
    # mathematically identical to the center-embedded kmax kernel with get_padding(kmax).
    wdw = _mix_depthwise_weight(params["dw_weight"], weights, kernel_list, kmax, use_argmax)
    wdw_taps = jnp.transpose(wdw, (1, 2, 0)).reshape(KK, C_in)             # (KK, C_in)
    wpw = params["pw_weight"][:, :, 0, 0].astype(jnp.float32)              # (C_out, C_in)
    wcomb = (wpw[:, None, :] * wdw_taps[None, :, :]).reshape(C_out, KKC)
    wcomb = jnp.pad(wcomb, ((0, 0), (0, KKC_pad - KKC)))                   # zero pad rows
    wcomb = wcomb.astype(compute_dtype)

    # ---- static per-tap lane shifts and boundary masks (trace-time numpy constants) ----
    shifts = []
    mask_np = np.zeros((KK, HW), np.float32)
    hh = np.arange(H)[:, None]
    ww = np.arange(W)[None, :]
    for ti in range(kmax):
        for tj in range(kmax):
            t = ti * kmax + tj
            di = dil * ti - pad
            dj = dil * tj - pad
            shifts.append(di * W + dj)
            valid = (hh + di >= 0) & (hh + di < H) & (ww + dj >= 0) & (ww + dj < W)
            mask_np[t] = valid.reshape(-1).astype(np.float32)
    masks = jnp.asarray(mask_np, dtype=compute_dtype)

    # NCHW -> (N, C_in, H*W): contiguity-preserving reshape (free), lane-dense in-kernel.
    x_flat = x.reshape(N, C_in, HW).astype(compute_dtype)

    B_blk = batch_block or _pick_batch_block(N, HW, elt, KKC_pad)
    nblocks = N // B_blk
    width = B_blk * HW
    zero_start = (KKC // 8) * 8

    per_step_bytes = (2 * (B_blk * C_in * HW * elt            # x block (double buffered)
                           + C_out * width * elt              # y block
                           + C_out * 2 * 4)                   # partials block
                      + 2 * (C_out * KKC_pad * elt + KK * HW * elt)   # resident w + masks
                      + KKC_pad * width * elt)                # patch scratch
    vmem_limit = _vmem_limit_bytes(per_step_bytes)

    # ---- pass 1: fused ReLU + dilated depthwise + pointwise, + BN partial sums ---------
    kern1 = functools.partial(
        fused_dilconv_kernel, B_blk=B_blk, C_in=C_in, HW=HW, KKC=KKC,
        shifts=tuple(shifts), zero_start=zero_start)
    cost = pl.CostEstimate(
        flops=2 * N * HW * C_out * KKC_pad,
        transcendentals=0,
        bytes_accessed=(N * C_in * HW * elt + C_out * KKC_pad * elt + KK * HW * elt
                        + C_out * N * HW * elt + nblocks * C_out * 2 * 4))

    y, partials = pl.pallas_call(
        kern1,
        grid=(nblocks,),
        in_specs=[
            pl.BlockSpec((B_blk, C_in, HW), lambda nb: (nb, 0, 0)),
            pl.BlockSpec((C_out, KKC_pad), lambda nb: (0, 0)),
            pl.BlockSpec((KK, HW), lambda nb: (0, 0)),
        ],
        out_specs=[
            pl.BlockSpec((C_out, width), lambda nb: (0, nb)),
            pl.BlockSpec((1, C_out, 2), lambda nb: (nb, 0, 0)),
        ],
        out_shape=[
            jax.ShapeDtypeStruct((C_out, N * HW), compute_dtype),   # channel-major conv output
            jax.ShapeDtypeStruct((nblocks, C_out, 2), jnp.float32),
        ],
        scratch_shapes=[pltpu.VMEM((KKC_pad, width), compute_dtype)],
        compiler_params=pltpu.CompilerParams(
            dimension_semantics=("parallel",),
            vmem_limit_bytes=vmem_limit),
        cost_estimate=cost,
    )(x_flat, wcomb, masks)

    # ---- BatchNorm2d training-mode batch statistics from per-block partials ------------
    cnt = jnp.float32(N * HW)
    mean = jnp.sum(partials[:, :, 0], axis=0) / cnt
    ex2 = jnp.sum(partials[:, :, 1], axis=0) / cnt
    # NOTE: E[x^2]-mean^2 can lose precision for very large N*H*W; fine at these scales.
    var = jnp.maximum(ex2 - mean * mean, 0.0)
    inv = lax.rsqrt(var + eps)
    gamma = params["bn_gamma"].astype(jnp.float32)
    beta = params["bn_beta"].astype(jnp.float32)
    scale = (gamma * inv).reshape(C_out, 1)
    shift = (beta - mean * gamma * inv).reshape(C_out, 1)

    # ---- pass 2: apply BN; CNHW -> NCHW reorder done purely via BlockSpec indexing -----
    kern2 = functools.partial(bn_apply_kernel, B_blk=B_blk, HW=HW)
    out = pl.pallas_call(
        kern2,
        grid=(nblocks,),
        in_specs=[
            pl.BlockSpec((C_out, width), lambda nb: (0, nb)),
            pl.BlockSpec((C_out, 1), lambda nb: (0, 0)),
            pl.BlockSpec((C_out, 1), lambda nb: (0, 0)),
        ],
        out_specs=pl.BlockSpec((B_blk, C_out, HW), lambda nb: (nb, 0, 0)),
        out_shape=jax.ShapeDtypeStruct((N, C_out, HW), jnp.float32),
        compiler_params=pltpu.CompilerParams(
            dimension_semantics=("parallel",),
            vmem_limit_bytes=vmem_limit),
    )(y, scale, shift)

    return out.reshape(N, C_out, H, W)   # already NCHW-ordered: free reshape, no transpose


# --------------------------------------------------------------------------------------
# Pure-JAX reference (mirrors the PyTorch forward) for correctness checking.
# --------------------------------------------------------------------------------------
def dilconv_mixture_reference(x_nchw, weights, params, *, kernel_list, kernel_max,
                              dilation=2, use_argmax=False):
    N, C_in, H, W = x_nchw.shape
    kmax = kernel_max
    pad = dilation * (kmax - 1) // 2
    wdw = _mix_depthwise_weight(params["dw_weight"], weights, kernel_list, kmax, use_argmax)
    xr = jnp.maximum(x_nchw.astype(jnp.float32), 0.0)
    dw = lax.conv_general_dilated(
        xr, wdw[:, None, :, :], window_strides=(1, 1),
        padding=((pad, pad), (pad, pad)), rhs_dilation=(dilation, dilation),
        dimension_numbers=("NCHW", "OIHW", "NCHW"), feature_group_count=C_in)
    pw = lax.conv_general_dilated(
        dw, params["pw_weight"].astype(jnp.float32), window_strides=(1, 1),
        padding="VALID", dimension_numbers=("NCHW", "OIHW", "NCHW"))
    mean = jnp.mean(pw, axis=(0, 2, 3), keepdims=True)
    var = jnp.mean(jnp.square(pw - mean), axis=(0, 2, 3), keepdims=True)
    g = params["bn_gamma"][None, :, None, None]
    b = params["bn_beta"][None, :, None, None]
    return (pw - mean) * lax.rsqrt(var + 1e-5) * g + b


if __name__ == "__main__":
    kernel_list = [3, 5]
    kernel_max = 5
    N, C_in, C_out, H, W = 2, 4, 8, 16, 16

    key = jax.random.PRNGKey(0)
    k1, k2, k3, k4 = jax.random.split(key, 4)
    params = {
        "dw_weight": 0.1 * jax.random.normal(k1, (C_in, 1, kernel_max, kernel_max), jnp.float32),
        "pw_weight": 0.1 * jax.random.normal(k2, (C_out, C_in, 1, 1), jnp.float32),
        "bn_gamma": jnp.ones((C_out,), jnp.float32),   # PyTorch BatchNorm2d default init
        "bn_beta": jnp.zeros((C_out,), jnp.float32),
    }
    x = jax.random.normal(k3, (N, C_in, H, W), jnp.float32)
    weights = jax.nn.softmax(jax.random.normal(k4, (len(kernel_list),), jnp.float32))

    ref = dilconv_mixture_reference(x, weights, params, kernel_list=kernel_list,
                                    kernel_max=kernel_max, dilation=2, use_argmax=False)

    # f32 path (v5e-friendly) -----------------------------------------------------------
    fwd_f32 = jax.jit(functools.partial(
        dilconv_mixture_forward, kernel_list=kernel_list, kernel_max=kernel_max,
        dilation=2, use_argmax=False, compute_dtype=jnp.float32))
    out_f32 = jax.block_until_ready(fwd_f32(x, weights, params))
    np.testing.assert_allclose(np.asarray(out_f32), np.asarray(ref), rtol=2e-3, atol=2e-3)

    # use_argmax branch (jit-safe argmax) ------------------------------------------------
    fwd_am = jax.jit(functools.partial(
        dilconv_mixture_forward, kernel_list=kernel_list, kernel_max=kernel_max,
        dilation=2, use_argmax=True, compute_dtype=jnp.float32))
    out_am = jax.block_until_ready(fwd_am(x, weights, params))
    ref_am = dilconv_mixture_reference(x, weights, params, kernel_list=kernel_list,
                                       kernel_max=kernel_max, dilation=2, use_argmax=True)
    np.testing.assert_allclose(np.asarray(out_am), np.asarray(ref_am), rtol=2e-3, atol=2e-3)

    # bf16 MXU path (v6e/v7x): bf16 in VMEM end-to-end, f32 accumulation ----------------
    fwd_bf16 = jax.jit(functools.partial(
        dilconv_mixture_forward, kernel_list=kernel_list, kernel_max=kernel_max,
        dilation=2, use_argmax=False, compute_dtype=jnp.bfloat16))
    out_bf16 = jax.block_until_ready(fwd_bf16(x, weights, params))
    rel_l2 = (np.linalg.norm(np.asarray(out_bf16, dtype=np.float32) - np.asarray(ref))
              / np.linalg.norm(np.asarray(ref)))
    assert rel_l2 < 5e-2, f"bf16 path relative L2 error too large: {rel_l2}"

    print("KERNEL_OK")
</pallas_src>

<mosaic_0001>
module attributes {stable_mosaic.version = 11 : i64} {
  func.func @bn_apply_kernel(%arg0: i32, %arg1: memref<8x512xf32, #tpu.memory_space<vmem>>, %arg2: memref<8x1xf32, #tpu.memory_space<vmem>>, %arg3: memref<8x1xf32, #tpu.memory_space<vmem>>, %arg4: memref<2x8x256xf32, #tpu.memory_space<vmem>>) attributes {dimension_semantics = [#tpu.dimension_semantics<parallel>], iteration_bounds = array<i64: 1>, scalar_prefetch = 0 : i64, scratch_operands = 0 : i64, tpu.core_type = #tpu.core_type<tc>, window_params = [{transform_indices = @transform_0, window_bounds = array<i64: 8, 512>}, {pipeline_mode = #tpu.pipeline_mode<synchronous>, transform_indices = @transform_1, window_bounds = array<i64: 8, 1>}, {pipeline_mode = #tpu.pipeline_mode<synchronous>, transform_indices = @transform_2, window_bounds = array<i64: 8, 1>}, {transform_indices = @transform_3, window_bounds = array<i64: 2, 8, 256>}]} {
    %c0 = arith.constant 0 : index
    %c0_0 = arith.constant 0 : index
    %0 = vector.load %arg2[%c0, %c0_0] : memref<8x1xf32, #tpu.memory_space<vmem>>, vector<8x1xf32>
    %c0_1 = arith.constant 0 : index
    %c0_2 = arith.constant 0 : index
    %1 = vector.load %arg3[%c0_1, %c0_2] : memref<8x1xf32, #tpu.memory_space<vmem>>, vector<8x1xf32>
    %c0_3 = arith.constant 0 : index
    %c0_4 = arith.constant 0 : index
    %2 = vector.load %arg1[%c0_3, %c0_4] : memref<8x512xf32, #tpu.memory_space<vmem>>, vector<8x256xf32>
    %3 = vector.broadcast %0 : vector<8x1xf32> to vector<8x256xf32>
    %4 = arith.mulf %2, %3 : vector<8x256xf32>
    %5 = vector.broadcast %1 : vector<8x1xf32> to vector<8x256xf32>
    %6 = arith.addf %4, %5 : vector<8x256xf32>
    %c0_5 = arith.constant 0 : index
    %c0_6 = arith.constant 0 : index
    %c0_7 = arith.constant 0 : index
    %7 = vector.load %arg4[%c0_5, %c0_6, %c0_7] : memref<2x8x256xf32, #tpu.memory_space<vmem>>, vector<1x8x256xf32>
    %8 = vector.shape_cast %7 : vector<1x8x256xf32> to vector<8x256xf32>
    %9 = vector.shape_cast %6 : vector<8x256xf32> to vector<1x8x256xf32>
    tpu.vector_store %arg4[%c0_5, %c0_6, %c0_7], %9 {strides = array<i32>} : memref<2x8x256xf32, #tpu.memory_space<vmem>>, vector<1x8x256xf32>,
    %c0_8 = arith.constant 0 : index
    %c256 = arith.constant 256 : index
    %10 = vector.load %arg1[%c0_8, %c256] : memref<8x512xf32, #tpu.memory_space<vmem>>, vector<8x256xf32>
    %11 = vector.broadcast %0 : vector<8x1xf32> to vector<8x256xf32>
    %12 = arith.mulf %10, %11 : vector<8x256xf32>
    %13 = vector.broadcast %1 : vector<8x1xf32> to vector<8x256xf32>
    %14 = arith.addf %12, %13 : vector<8x256xf32>
    %c1 = arith.constant 1 : index
    %c0_9 = arith.constant 0 : index
    %c0_10 = arith.constant 0 : index
    %15 = vector.load %arg4[%c1, %c0_9, %c0_10] : memref<2x8x256xf32, #tpu.memory_space<vmem>>, vector<1x8x256xf32>
    %16 = vector.shape_cast %15 : vector<1x8x256xf32> to vector<8x256xf32>
    %17 = vector.shape_cast %14 : vector<8x256xf32> to vector<1x8x256xf32>
    tpu.vector_store %arg4[%c1, %c0_9, %c0_10], %17 {strides = array<i32>} : memref<2x8x256xf32, #tpu.memory_space<vmem>>, vector<1x8x256xf32>,
    return
  }
  func.func @transform_0(%arg0: i32) -> (i32, i32) {
    %c0_i32 = arith.constant 0 : i32
    %c0_i32_0 = arith.constant 0 : i32
    return %c0_i32, %arg0 : i32, i32
  }
  func.func @transform_1(%arg0: i32) -> (i32, i32) {
    %c0_i32 = arith.constant 0 : i32
    %c0_i32_0 = arith.constant 0 : i32
    %c0_i32_1 = arith.constant 0 : i32
    return %c0_i32, %c0_i32_0 : i32, i32
  }
  func.func @transform_2(%arg0: i32) -> (i32, i32) {
    %c0_i32 = arith.constant 0 : i32
    %c0_i32_0 = arith.constant 0 : i32
    %c0_i32_1 = arith.constant 0 : i32
    return %c0_i32, %c0_i32_0 : i32, i32
  }
  func.func @transform_3(%arg0: i32) -> (i32, i32, i32) {
    %c0_i32 = arith.constant 0 : i32
    %c0_i32_0 = arith.constant 0 : i32
    %c0_i32_1 = arith.constant 0 : i32
    return %arg0, %c0_i32, %c0_i32_0 : i32, i32, i32
  }
}

module attributes {stable_mosaic.version = 11 : i64} {
  func.func @fused_dilconv_kernel(%arg0: i32, %arg1: memref<2x4x256xf32, #tpu.memory_space<vmem>>, %arg2: memref<8x128xf32, #tpu.memory_space<vmem>>, %arg3: memref<25x256xf32, #tpu.memory_space<vmem>>, %arg4: memref<8x512xf32, #tpu.memory_space<vmem>>, %arg5: memref<1x8x2xf32, #tpu.memory_space<vmem>>, %arg6: memref<128x512xf32, #tpu.memory_space<vmem>>) attributes {dimension_semantics = [#tpu.dimension_semantics<parallel>], iteration_bounds = array<i64: 1>, scalar_prefetch = 0 : i64, scratch_operands = 1 : i64, tpu.core_type = #tpu.core_type<tc>, window_params = [{transform_indices = @transform_0, window_bounds = array<i64: 2, 4, 256>}, {pipeline_mode = #tpu.pipeline_mode<synchronous>, transform_indices = @transform_1, window_bounds = array<i64: 8, 128>}, {pipeline_mode = #tpu.pipeline_mode<synchronous>, transform_indices = @transform_2, window_bounds = array<i64: 25, 256>}, {transform_indices = @transform_3, window_bounds = array<i64: 8, 512>}, {transform_indices = @transform_4, window_bounds = array<i64: 1, 8, 2>}]} {
    %cst = arith.constant 0.000000e+00 : f32
    %0 = vector.broadcast %cst : f32 to vector<32x512xf32>
    %c96 = arith.constant 96 : index
    %c0 = arith.constant 0 : index
    %1 = vector.load %arg6[%c96, %c0] : memref<128x512xf32, #tpu.memory_space<vmem>>, vector<32x512xf32>
    tpu.vector_store %arg6[%c96, %c0], %0 {strides = array<i32>} : memref<128x512xf32, #tpu.memory_space<vmem>>, vector<32x512xf32>,
    %c0_0 = arith.constant 0 : index
    %c0_1 = arith.constant 0 : index
    %2 = vector.load %arg3[%c0_0, %c0_1] : memref<25x256xf32, #tpu.memory_space<vmem>>, vector<25x256xf32>
    %c0_2 = arith.constant 0 : index
    %c0_3 = arith.constant 0 : index
    %c0_4 = arith.constant 0 : index
    %3 = vector.load %arg1[%c0_2, %c0_3, %c0_4] : memref<2x4x256xf32, #tpu.memory_space<vmem>>, vector<1x4x256xf32>
    %4 = vector.shape_cast %3 : vector<1x4x256xf32> to vector<4x256xf32>
    %cst_5 = arith.constant 0.000000e+00 : f32
    %5 = vector.broadcast %cst_5 : f32 to vector<4x256xf32>
    %6 = arith.maximumf %4, %5 : vector<4x256xf32>
    %7 = vector.extract_strided_slice %6 {offsets = [0, 188], sizes = [4, 68], strides = [1, 1]} : vector<4x256xf32> to vector<4x68xf32>
    %8 = vector.extract_strided_slice %6 {offsets = [0, 0], sizes = [4, 188], strides = [1, 1]} : vector<4x256xf32> to vector<4x188xf32>
    %9 = tpu.concatenate %7, %8 in 1 : vector<4x68xf32>, vector<4x188xf32> -> vector<4x256xf32>
    %10 = vector.extract_strided_slice %2 {offsets = [0, 0], sizes = [1, 256], strides = [1, 1]} : vector<25x256xf32> to vector<1x256xf32>
    %11 = vector.broadcast %10 : vector<1x256xf32> to vector<4x256xf32>
    %12 = arith.mulf %9, %11 : vector<4x256xf32>
    %c0_6 = arith.constant 0 : index
    %c0_7 = arith.constant 0 : index
    %13 = vector.load %arg6[%c0_6, %c0_7] : memref<128x512xf32, #tpu.memory_space<vmem>>, vector<4x256xf32>
    tpu.vector_store %arg6[%c0_6, %c0_7], %12 {strides = array<i32>} : memref<128x512xf32, #tpu.memory_space<vmem>>, vector<4x256xf32>,
    %14 = vector.extract_strided_slice %6 {offsets = [0, 190], sizes = [4, 66], strides = [1, 1]} : vector<4x256xf32> to vector<4x66xf32>
    %15 = vector.extract_strided_slice %6 {offsets = [0, 0], sizes = [4, 190], strides = [1, 1]} : vector<4x256xf32> to vector<4x190xf32>
    %16 = tpu.concatenate %14, %15 in 1 : vector<4x66xf32>, vector<4x190xf32> -> vector<4x256xf32>
    %17 = vector.extract_strided_slice %2 {offsets = [1, 0], sizes = [1, 256], strides = [1, 1]} : vector<25x256xf32> to vector<1x256xf32>
    %18 = vector.broadcast %17 : vector<1x256xf32> to vector<4x256xf32>
    %19 = arith.mulf %16, %18 : vector<4x256xf32>
    %c4 = arith.constant 4 : index
    %c0_8 = arith.constant 0 : index
    %20 = vector.load %arg6[%c4, %c0_8] : memref<128x512xf32, #tpu.memory_space<vmem>>, vector<4x256xf32>
    tpu.vector_store %arg6[%c4, %c0_8], %19 {strides = array<i32>} : memref<128x512xf32, #tpu.memory_space<vmem>>, vector<4x256xf32>,
    %21 = vector.extract_strided_slice %6 {offsets = [0, 192], sizes = [4, 64], strides = [1, 1]} : vector<4x256xf32> to vector<4x64xf32>
    %22 = vector.extract_strided_slice %6 {offsets = [0, 0], sizes = [4, 192], strides = [1, 1]} : vector<4x256xf32> to vector<4x192xf32>
    %23 = tpu.concatenate %21, %22 in 1 : vector<4x64xf32>, vector<4x192xf32> -> vector<4x256xf32>
    %24 = vector.extract_strided_slice %2 {offsets = [2, 0], sizes = [1, 256], strides = [1, 1]} : vector<25x256xf32> to vector<1x256xf32>
    %25 = vector.broadcast %24 : vector<1x256xf32> to vector<4x256xf32>
    %26 = arith.mulf %23, %25 : vector<4x256xf32>
    %c8 = arith.constant 8 : index
    %c0_9 = arith.constant 0 : index
    %27 = vector.load %arg6[%c8, %c0_9] : memref<128x512xf32, #tpu.memory_space<vmem>>, vector<4x256xf32>
    tpu.vector_store %arg6[%c8, %c0_9], %26 {strides = array<i32>} : memref<128x512xf32, #tpu.memory_space<vmem>>, vector<4x256xf32>,
    %28 = vector.extract_strided_slice %6 {offsets = [0, 194], sizes = [4, 62], strides = [1, 1]} : vector<4x256xf32> to vector<4x62xf32>
    %29 = vector.extract_strided_slice %6 {offsets = [0, 0], sizes = [4, 194], strides = [1, 1]} : vector<4x256xf32> to vector<4x194xf32>
    %30 = tpu.concatenate %28, %29 in 1 : vector<4x62xf32>, vector<4x194xf32> -> vector<4x256xf32>
    %31 = vector.extract_strided_slice %2 {offsets = [3, 0], sizes = [1, 256], strides = [1, 1]} : vector<25x256xf32> to vector<1x256xf32>
    %32 = vector.broadcast %31 : vector<1x256xf32> to vector<4x256xf32>
    %33 = arith.mulf %30, %32 : vector<4x256xf32>
    %c12 = arith.constant 12 : index
    %c0_10 = arith.constant 0 : index
    %34 = vector.load %arg6[%c12, %c0_10] : memref<128x512xf32, #tpu.memory_space<vmem>>, vector<4x256xf32>
    tpu.vector_store %arg6[%c12, %c0_10], %33 {strides = array<i32>} : memref<128x512xf32, #tpu.memory_space<vmem>>, vector<4x256xf32>,
    %35 = vector.extract_strided_slice %6 {offsets = [0, 196], sizes = [4, 60], strides = [1, 1]} : vector<4x256xf32> to vector<4x60xf32>
    %36 = vector.extract_strided_slice %6 {offsets = [0, 0], sizes = [4, 196], strides = [1, 1]} : vector<4x256xf32> to vector<4x196xf32>
    %37 = tpu.concatenate %35, %36 in 1 : vector<4x60xf32>, vector<4x196xf32> -> vector<4x256xf32>
    %38 = vector.extract_strided_slice %2 {offsets = [4, 0], sizes = [1, 256], strides = [1, 1]} : vector<25x256xf32> to vector<1x256xf32>
    %39 = vector.broadcast %38 : vector<1x256xf32> to vector<4x256xf32>
    %40 = arith.mulf %37, %39 : vector<4x256xf32>
    %c16 = arith.constant 16 : index
    %c0_11 = arith.constant 0 : index
    %41 = vector.load %arg6[%c16, %c0_11] : memref<128x512xf32, #tpu.memory_space<vmem>>, vector<4x256xf32>
    tpu.vector_store %arg6[%c16, %c0_11], %40 {strides = array<i32>} : memref<128x512xf32, #tpu.memory_space<vmem>>, vector<4x256xf32>,
    %42 = vector.extract_strided_slice %6 {offsets = [0, 220], sizes = [4, 36], strides = [1, 1]} : vector<4x256xf32> to vector<4x36xf32>
    %43 = vector.extract_strided_slice %6 {offsets = [0, 0], sizes = [4, 220], strides = [1, 1]} : vector<4x256xf32> to vector<4x220xf32>
    %44 = tpu.concatenate %42, %43 in 1 : vector<4x36xf32>, vector<4x220xf32> -> vector<4x256xf32>
    %45 = vector.extract_strided_slice %2 {offsets = [5, 0], sizes = [1, 256], strides = [1, 1]} : vector<25x256xf32> to vector<1x256xf32>
    %46 = vector.broadcast %45 : vector<1x256xf32> to vector<4x256xf32>
    %47 = arith.mulf %44, %46 : vector<4x256xf32>
    %c20 = arith.constant 20 : index
    %c0_12 = arith.constant 0 : index
    %48 = vector.load %arg6[%c20, %c0_12] : memref<128x512xf32, #tpu.memory_space<vmem>>, vector<4x256xf32>
    tpu.vector_store %arg6[%c20, %c0_12], %47 {strides = array<i32>} : memref<128x512xf32, #tpu.memory_space<vmem>>, vector<4x256xf32>,
    %49 = vector.extract_strided_slice %6 {offsets = [0, 222], sizes = [4, 34], strides = [1, 1]} : vector<4x256xf32> to vector<4x34xf32>
    %50 = vector.extract_strided_slice %6 {offsets = [0, 0], sizes = [4, 222], strides = [1, 1]} : vector<4x256xf32> to vector<4x222xf32>
    %51 = tpu.concatenate %49, %50 in 1 : vector<4x34xf32>, vector<4x222xf32> -> vector<4x256xf32>
    %52 = vector.extract_strided_slice %2 {offsets = [6, 0], sizes = [1, 256], strides = [1, 1]} : vector<25x256xf32> to vector<1x256xf32>
    %53 = vector.broadcast %52 : vector<1x256xf32> to vector<4x256xf32>
    %54 = arith.mulf %51, %53 : vector<4x256xf32>
    %c24 = arith.constant 24 : index
    %c0_13 = arith.constant 0 : index
    %55 = vector.load %arg6[%c24, %c0_13] : memref<128x512xf32, #tpu.memory_space<vmem>>, vector<4x256xf32>
    tpu.vector_store %arg6[%c24, %c0_13], %54 {strides = array<i32>} : memref<128x512xf32, #tpu.memory_space<vmem>>, vector<4x256xf32>,
    %56 = vector.extract_strided_slice %6 {offsets = [0, 224], sizes = [4, 32], strides = [1, 1]} : vector<4x256xf32> to vector<4x32xf32>
    %57 = vector.extract_strided_slice %6 {offsets = [0, 0], sizes = [4, 224], strides = [1, 1]} : vector<4x256xf32> to vector<4x224xf32>
    %58 = tpu.concatenate %56, %57 in 1 : vector<4x32xf32>, vector<4x224xf32> -> vector<4x256xf32>
    %59 = vector.extract_strided_slice %2 {offsets = [7, 0], sizes = [1, 256], strides = [1, 1]} : vector<25x256xf32> to vector<1x256xf32>
    %60 = vector.broadcast %59 : vector<1x256xf32> to vector<4x256xf32>
    %61 = arith.mulf %58, %60 : vector<4x256xf32>
    %c28 = arith.constant 28 : index
    %c0_14 = arith.constant 0 : index
    %62 = vector.load %arg6[%c28, %c0_14] : memref<128x512xf32, #tpu.memory_space<vmem>>, vector<4x256xf32>
    tpu.vector_store %arg6[%c28, %c0_14], %61 {strides = array<i32>} : memref<128x512xf32, #tpu.memory_space<vmem>>, vector<4x256xf32>,
    %63 = vector.extract_strided_slice %6 {offsets = [0, 226], sizes = [4, 30], strides = [1, 1]} : vector<4x256xf32> to vector<4x30xf32>
    %64 = vector.extract_strided_slice %6 {offsets = [0, 0], sizes = [4, 226], strides = [1, 1]} : vector<4x256xf32> to vector<4x226xf32>
    %65 = tpu.concatenate %63, %64 in 1 : vector<4x30xf32>, vector<4x226xf32> -> vector<4x256xf32>
    %66 = vector.extract_strided_slice %2 {offsets = [8, 0], sizes = [1, 256], strides = [1, 1]} : vector<25x256xf32> to vector<1x256xf32>
    %67 = vector.broadcast %66 : vector<1x256xf32> to vector<4x256xf32>
    %68 = arith.mulf %65, %67 : vector<4x256xf32>
    %c32 = arith.constant 32 : index
    %c0_15 = arith.constant 0 : index
    %69 = vector.load %arg6[%c32, %c0_15] : memref<128x512xf32, #tpu.memory_space<vmem>>, vector<4x256xf32>
    tpu.vector_store %arg6[%c32, %c0_15], %68 {strides = array<i32>} : memref<128x512xf32, #tpu.memory_space<vmem>>, vector<4x256xf32>,
    %70 = vector.extract_strided_slice %6 {offsets = [0, 228], sizes = [4, 28], strides = [1, 1]} : vector<4x256xf32> to vector<4x28xf32>
    %71 = vector.extract_strided_slice %6 {offsets = [0, 0], sizes = [4, 228], strides = [1, 1]} : vector<4x256xf32> to vector<4x228xf32>
    %72 = tpu.concatenate %70, %71 in 1 : vector<4x28xf32>, vector<4x228xf32> -> vector<4x256xf32>
    %73 = vector.extract_strided_slice %2 {offsets = [9, 0], sizes = [1, 256], strides = [1, 1]} : vector<25x256xf32> to vector<1x256xf32>
    %74 = vector.broadcast %73 : vector<1x256xf32> to vector<4x256xf32>
    %75 = arith.mulf %72, %74 : vector<4x256xf32>
    %c36 = arith.constant 36 : index
    %c0_16 = arith.constant 0 : index
    %76 = vector.load %arg6[%c36, %c0_16] : memref<128x512xf32, #tpu.memory_space<vmem>>, vector<4x256xf32>
    tpu.vector_store %arg6[%c36, %c0_16], %75 {strides = array<i32>} : memref<128x512xf32, #tpu.memory_space<vmem>>, vector<4x256xf32>,
    %77 = vector.extract_strided_slice %6 {offsets = [0, 252], sizes = [4, 4], strides = [1, 1]} : vector<4x256xf32> to vector<4x4xf32>
    %78 = vector.extract_strided_slice %6 {offsets = [0, 0], sizes = [4, 252], strides = [1, 1]} : vector<4x256xf32> to vector<4x252xf32>
    %79 = tpu.concatenate %77, %78 in 1 : vector<4x4xf32>, vector<4x252xf32> -> vector<4x256xf32>
    %80 = vector.extract_strided_slice %2 {offsets = [10, 0], sizes = [1, 256], strides = [1, 1]} : vector<25x256xf32> to vector<1x256xf32>
    %81 = vector.broadcast %80 : vector<1x256xf32> to vector<4x256xf32>
    %82 = arith.mulf %79, %81 : vector<4x256xf32>
    %c40 = arith.constant 40 : index
    %c0_17 = arith.constant 0 : index
    %83 = vector.load %arg6[%c40, %c0_17] : memref<128x512xf32, #tpu.memory_space<vmem>>, vector<4x256xf32>
    tpu.vector_store %arg6[%c40, %c0_17], %82 {strides = array<i32>} : memref<128x512xf32, #tpu.memory_space<vmem>>, vector<4x256xf32>,
    %84 = vector.extract_strided_slice %6 {offsets = [0, 254], sizes = [4, 2], strides = [1, 1]} : vector<4x256xf32> to vector<4x2xf32>
    %85 = vector.extract_strided_slice %6 {offsets = [0, 0], sizes = [4, 254], strides = [1, 1]} : vector<4x256xf32> to vector<4x254xf32>
    %86 = tpu.concatenate %84, %85 in 1 : vector<4x2xf32>, vector<4x254xf32> -> vector<4x256xf32>
    %87 = vector.extract_strided_slice %2 {offsets = [11, 0], sizes = [1, 256], strides = [1, 1]} : vector<25x256xf32> to vector<1x256xf32>
    %88 = vector.broadcast %87 : vector<1x256xf32> to vector<4x256xf32>
    %89 = arith.mulf %86, %88 : vector<4x256xf32>
    %c44 = arith.constant 44 : index
    %c0_18 = arith.constant 0 : index
    %90 = vector.load %arg6[%c44, %c0_18] : memref<128x512xf32, #tpu.memory_space<vmem>>, vector<4x256xf32>
    tpu.vector_store %arg6[%c44, %c0_18], %89 {strides = array<i32>} : memref<128x512xf32, #tpu.memory_space<vmem>>, vector<4x256xf32>,
    %91 = vector.extract_strided_slice %2 {offsets = [12, 0], sizes = [1, 256], strides = [1, 1]} : vector<25x256xf32> to vector<1x256xf32>
    %92 = vector.broadcast %91 : vector<1x256xf32> to vector<4x256xf32>
    %93 = arith.mulf %6, %92 : vector<4x256xf32>
    %c48 = arith.constant 48 : index
    %c0_19 = arith.constant 0 : index
    %94 = vector.load %arg6[%c48, %c0_19] : memref<128x512xf32, #tpu.memory_space<vmem>>, vector<4x256xf32>
    tpu.vector_store %arg6[%c48, %c0_19], %93 {strides = array<i32>} : memref<128x512xf32, #tpu.memory_space<vmem>>, vector<4x256xf32>,
    %95 = vector.extract_strided_slice %6 {offsets = [0, 2], sizes = [4, 254], strides = [1, 1]} : vector<4x256xf32> to vector<4x254xf32>
    %96 = vector.extract_strided_slice %6 {offsets = [0, 0], sizes = [4, 2], strides = [1, 1]} : vector<4x256xf32> to vector<4x2xf32>
    %97 = tpu.concatenate %95, %96 in 1 : vector<4x254xf32>, vector<4x2xf32> -> vector<4x256xf32>
    %98 = vector.extract_strided_slice %2 {offsets = [13, 0], sizes = [1, 256], strides = [1, 1]} : vector<25x256xf32> to vector<1x256xf32>
    %99 = vector.broadcast %98 : vector<1x256xf32> to vector<4x256xf32>
    %100 = arith.mulf %97, %99 : vector<4x256xf32>
    %c52 = arith.constant 52 : index
    %c0_20 = arith.constant 0 : index
    %101 = vector.load %arg6[%c52, %c0_20] : memref<128x512xf32, #tpu.memory_space<vmem>>, vector<4x256xf32>
    tpu.vector_store %arg6[%c52, %c0_20], %100 {strides = array<i32>} : memref<128x512xf32, #tpu.memory_space<vmem>>, vector<4x256xf32>,
    %102 = vector.extract_strided_slice %6 {offsets = [0, 4], sizes = [4, 252], strides = [1, 1]} : vector<4x256xf32> to vector<4x252xf32>
    %103 = vector.extract_strided_slice %6 {offsets = [0, 0], sizes = [4, 4], strides = [1, 1]} : vector<4x256xf32> to vector<4x4xf32>
    %104 = tpu.concatenate %102, %103 in 1 : vector<4x252xf32>, vector<4x4xf32> -> vector<4x256xf32>
    %105 = vector.extract_strided_slice %2 {offsets = [14, 0], sizes = [1, 256], strides = [1, 1]} : vector<25x256xf32> to vector<1x256xf32>
    %106 = vector.broadcast %105 : vector<1x256xf32> to vector<4x256xf32>
    %107 = arith.mulf %104, %106 : vector<4x256xf32>
    %c56 = arith.constant 56 : index
    %c0_21 = arith.constant 0 : index
    %108 = vector.load %arg6[%c56, %c0_21] : memref<128x512xf32, #tpu.memory_space<vmem>>, vector<4x256xf32>
    tpu.vector_store %arg6[%c56, %c0_21], %107 {strides = array<i32>} : memref<128x512xf32, #tpu.memory_space<vmem>>, vector<4x256xf32>,
    %109 = vector.extract_strided_slice %6 {offsets = [0, 28], sizes = [4, 228], strides = [1, 1]} : vector<4x256xf32> to vector<4x228xf32>
    %110 = vector.extract_strided_slice %6 {offsets = [0, 0], sizes = [4, 28], strides = [1, 1]} : vector<4x256xf32> to vector<4x28xf32>
    %111 = tpu.concatenate %109, %110 in 1 : vector<4x228xf32>, vector<4x28xf32> -> vector<4x256xf32>
    %112 = vector.extract_strided_slice %2 {offsets = [15, 0], sizes = [1, 256], strides = [1, 1]} : vector<25x256xf32> to vector<1x256xf32>
    %113 = vector.broadcast %112 : vector<1x256xf32> to vector<4x256xf32>
    %114 = arith.mulf %111, %113 : vector<4x256xf32>
    %c60 = arith.constant 60 : index
    %c0_22 = arith.constant 0 : index
    %115 = vector.load %arg6[%c60, %c0_22] : memref<128x512xf32, #tpu.memory_space<vmem>>, vector<4x256xf32>
    tpu.vector_store %arg6[%c60, %c0_22], %114 {strides = array<i32>} : memref<128x512xf32, #tpu.memory_space<vmem>>, vector<4x256xf32>,
    %116 = vector.extract_strided_slice %6 {offsets = [0, 30], sizes = [4, 226], strides = [1, 1]} : vector<4x256xf32> to vector<4x226xf32>
    %117 = vector.extract_strided_slice %6 {offsets = [0, 0], sizes = [4, 30], strides = [1, 1]} : vector<4x256xf32> to vector<4x30xf32>
    %118 = tpu.concatenate %116, %117 in 1 : vector<4x226xf32>, vector<4x30xf32> -> vector<4x256xf32>
    %119 = vector.extract_strided_slice %2 {offsets = [16, 0], sizes = [1, 256], strides = [1, 1]} : vector<25x256xf32> to vector<1x256xf32>
    %120 = vector.broadcast %119 : vector<1x256xf32> to vector<4x256xf32>
    %121 = arith.mulf %118, %120 : vector<4x256xf32>
    %c64 = arith.constant 64 : index
    %c0_23 = arith.constant 0 : index
    %122 = vector.load %arg6[%c64, %c0_23] : memref<128x512xf32, #tpu.memory_space<vmem>>, vector<4x256xf32>
    tpu.vector_store %arg6[%c64, %c0_23], %121 {strides = array<i32>} : memref<128x512xf32, #tpu.memory_space<vmem>>, vector<4x256xf32>,
    %123 = vector.extract_strided_slice %6 {offsets = [0, 32], sizes = [4, 224], strides = [1, 1]} : vector<4x256xf32> to vector<4x224xf32>
    %124 = vector.extract_strided_slice %6 {offsets = [0, 0], sizes = [4, 32], strides = [1, 1]} : vector<4x256xf32> to vector<4x32xf32>
    %125 = tpu.concatenate %123, %124 in 1 : vector<4x224xf32>, vector<4x32xf32> -> vector<4x256xf32>
    %126 = vector.extract_strided_slice %2 {offsets = [17, 0], sizes = [1, 256], strides = [1, 1]} : vector<25x256xf32> to vector<1x256xf32>
    %127 = vector.broadcast %126 : vector<1x256xf32> to vector<4x256xf32>
    %128 = arith.mulf %125, %127 : vector<4x256xf32>
    %c68 = arith.constant 68 : index
    %c0_24 = arith.constant 0 : index
    %129 = vector.load %arg6[%c68, %c0_24] : memref<128x512xf32, #tpu.memory_space<vmem>>, vector<4x256xf32>
    tpu.vector_store %arg6[%c68, %c0_24], %128 {strides = array<i32>} : memref<128x512xf32, #tpu.memory_space<vmem>>, vector<4x256xf32>,
    %130 = vector.extract_strided_slice %6 {offsets = [0, 34], sizes = [4, 222], strides = [1, 1]} : vector<4x256xf32> to vector<4x222xf32>
    %131 = vector.extract_strided_slice %6 {offsets = [0, 0], sizes = [4, 34], strides = [1, 1]} : vector<4x256xf32> to vector<4x34xf32>
    %132 = tpu.concatenate %130, %131 in 1 : vector<4x222xf32>, vector<4x34xf32> -> vector<4x256xf32>
    %133 = vector.extract_strided_slice %2 {offsets = [18, 0], sizes = [1, 256], strides = [1, 1]} : vector<25x256xf32> to vector<1x256xf32>
    %134 = vector.broadcast %133 : vector<1x256xf32> to vector<4x256xf32>
    %135 = arith.mulf %132, %134 : vector<4x256xf32>
    %c72 = arith.constant 72 : index
    %c0_25 = arith.constant 0 : index
    %136 = vector.load %arg6[%c72, %c0_25] : memref<128x512xf32, #tpu.memory_space<vmem>>, vector<4x256xf32>
    tpu.vector_store %arg6[%c72, %c0_25], %135 {strides = array<i32>} : memref<128x512xf32, #tpu.memory_space<vmem>>, vector<4x256xf32>,
    %137 = vector.extract_strided_slice %6 {offsets = [0, 36], sizes = [4, 220], strides = [1, 1]} : vector<4x256xf32> to vector<4x220xf32>
    %138 = vector.extract_strided_slice %6 {offsets = [0, 0], sizes = [4, 36], strides = [1, 1]} : vector<4x256xf32> to vector<4x36xf32>
    %139 = tpu.concatenate %137, %138 in 1 : vector<4x220xf32>, vector<4x36xf32> -> vector<4x256xf32>
    %140 = vector.extract_strided_slice %2 {offsets = [19, 0], sizes = [1, 256], strides = [1, 1]} : vector<25x256xf32> to vector<1x256xf32>
    %141 = vector.broadcast %140 : vector<1x256xf32> to vector<4x256xf32>
    %142 = arith.mulf %139, %141 : vector<4x256xf32>
    %c76 = arith.constant 76 : index
    %c0_26 = arith.constant 0 : index
    %143 = vector.load %arg6[%c76, %c0_26] : memref<128x512xf32, #tpu.memory_space<vmem>>, vector<4x256xf32>
    tpu.vector_store %arg6[%c76, %c0_26], %142 {strides = array<i32>} : memref<128x512xf32, #tpu.memory_space<vmem>>, vector<4x256xf32>,
    %144 = vector.extract_strided_slice %6 {offsets = [0, 60], sizes = [4, 196], strides = [1, 1]} : vector<4x256xf32> to vector<4x196xf32>
    %145 = vector.extract_strided_slice %6 {offsets = [0, 0], sizes = [4, 60], strides = [1, 1]} : vector<4x256xf32> to vector<4x60xf32>
    %146 = tpu.concatenate %144, %145 in 1 : vector<4x196xf32>, vector<4x60xf32> -> vector<4x256xf32>
    %147 = vector.extract_strided_slice %2 {offsets = [20, 0], sizes = [1, 256], strides = [1, 1]} : vector<25x256xf32> to vector<1x256xf32>
    %148 = vector.broadcast %147 : vector<1x256xf32> to vector<4x256xf32>
    %149 = arith.mulf %146, %148 : vector<4x256xf32>
    %c80 = arith.constant 80 : index
    %c0_27 = arith.constant 0 : index
    %150 = vector.load %arg6[%c80, %c0_27] : memref<128x512xf32, #tpu.memory_space<vmem>>, vector<4x256xf32>
    tpu.vector_store %arg6[%c80, %c0_27], %149 {strides = array<i32>} : memref<128x512xf32, #tpu.memory_space<vmem>>, vector<4x256xf32>,
    %151 = vector.extract_strided_slice %6 {offsets = [0, 62], sizes = [4, 194], strides = [1, 1]} : vector<4x256xf32> to vector<4x194xf32>
    %152 = vector.extract_strided_slice %6 {offsets = [0, 0], sizes = [4, 62], strides = [1, 1]} : vector<4x256xf32> to vector<4x62xf32>
    %153 = tpu.concatenate %151, %152 in 1 : vector<4x194xf32>, vector<4x62xf32> -> vector<4x256xf32>
    %154 = vector.extract_strided_slice %2 {offsets = [21, 0], sizes = [1, 256], strides = [1, 1]} : vector<25x256xf32> to vector<1x256xf32>
    %155 = vector.broadcast %154 : vector<1x256xf32> to vector<4x256xf32>
    %156 = arith.mulf %153, %155 : vector<4x256xf32>
    %c84 = arith.constant 84 : index
    %c0_28 = arith.constant 0 : index
    %157 = vector.load %arg6[%c84, %c0_28] : memref<128x512xf32, #tpu.memory_space<vmem>>, vector<4x256xf32>
    tpu.vector_store %arg6[%c84, %c0_28], %156 {strides = array<i32>} : memref<128x512xf32, #tpu.memory_space<vmem>>, vector<4x256xf32>,
    %158 = vector.extract_strided_slice %6 {offsets = [0, 64], sizes = [4, 192], strides = [1, 1]} : vector<4x256xf32> to vector<4x192xf32>
    %159 = vector.extract_strided_slice %6 {offsets = [0, 0], sizes = [4, 64], strides = [1, 1]} : vector<4x256xf32> to vector<4x64xf32>
    %160 = tpu.concatenate %158, %159 in 1 : vector<4x192xf32>, vector<4x64xf32> -> vector<4x256xf32>
    %161 = vector.extract_strided_slice %2 {offsets = [22, 0], sizes = [1, 256], strides = [1, 1]} : vector<25x256xf32> to vector<1x256xf32>
    %162 = vector.broadcast %161 : vector<1x256xf32> to vector<4x256xf32>
    %163 = arith.mulf %160, %162 : vector<4x256xf32>
    %c88 = arith.constant 88 : index
    %c0_29 = arith.constant 0 : index
    %164 = vector.load %arg6[%c88, %c0_29] : memref<128x512xf32, #tpu.memory_space<vmem>>, vector<4x256xf32>
    tpu.vector_store %arg6[%c88, %c0_29], %163 {strides = array<i32>} : memref<128x512xf32, #tpu.memory_space<vmem>>, vector<4x256xf32>,
    %165 = vector.extract_strided_slice %6 {offsets = [0, 66], sizes = [4, 190], strides = [1, 1]} : vector<4x256xf32> to vector<4x190xf32>
    %166 = vector.extract_strided_slice %6 {offsets = [0, 0], sizes = [4, 66], strides = [1, 1]} : vector<4x256xf32> to vector<4x66xf32>
    %167 = tpu.concatenate %165, %166 in 1 : vector<4x190xf32>, vector<4x66xf32> -> vector<4x256xf32>
    %168 = vector.extract_strided_slice %2 {offsets = [23, 0], sizes = [1, 256], strides = [1, 1]} : vector<25x256xf32> to vector<1x256xf32>
    %169 = vector.broadcast %168 : vector<1x256xf32> to vector<4x256xf32>
    %170 = arith.mulf %167, %169 : vector<4x256xf32>
    %c92 = arith.constant 92 : index
    %c0_30 = arith.constant 0 : index
    %171 = vector.load %arg6[%c92, %c0_30] : memref<128x512xf32, #tpu.memory_space<vmem>>, vector<4x256xf32>
    tpu.vector_store %arg6[%c92, %c0_30], %170 {strides = array<i32>} : memref<128x512xf32, #tpu.memory_space<vmem>>, vector<4x256xf32>,
    %172 = vector.extract_strided_slice %6 {offsets = [0, 68], sizes = [4, 188], strides = [1, 1]} : vector<4x256xf32> to vector<4x188xf32>
    %173 = vector.extract_strided_slice %6 {offsets = [0, 0], sizes = [4, 68], strides = [1, 1]} : vector<4x256xf32> to vector<4x68xf32>
    %174 = tpu.concatenate %172, %173 in 1 : vector<4x188xf32>, vector<4x68xf32> -> vector<4x256xf32>
    %175 = vector.extract_strided_slice %2 {offsets = [24, 0], sizes = [1, 256], strides = [1, 1]} : vector<25x256xf32> to vector<1x256xf32>
    %176 = vector.broadcast %175 : vector<1x256xf32> to vector<4x256xf32>
    %177 = arith.mulf %174, %176 : vector<4x256xf32>
    %c96_31 = arith.constant 96 : index
    %c0_32 = arith.constant 0 : index
    %178 = vector.load %arg6[%c96_31, %c0_32] : memref<128x512xf32, #tpu.memory_space<vmem>>, vector<4x256xf32>
    tpu.vector_store %arg6[%c96_31, %c0_32], %177 {strides = array<i32>} : memref<128x512xf32, #tpu.memory_space<vmem>>, vector<4x256xf32>,
    %c1 = arith.constant 1 : index
    %c0_33 = arith.constant 0 : index
    %c0_34 = arith.constant 0 : index
    %179 = vector.load %arg1[%c1, %c0_33, %c0_34] : memref<2x4x256xf32, #tpu.memory_space<vmem>>, vector<1x4x256xf32>
    %180 = vector.shape_cast %179 : vector<1x4x256xf32> to vector<4x256xf32>
    %cst_35 = arith.constant 0.000000e+00 : f32
    %181 = vector.broadcast %cst_35 : f32 to vector<4x256xf32>
    %182 = arith.maximumf %180, %181 : vector<4x256xf32>
    %183 = vector.extract_strided_slice %182 {offsets = [0, 188], sizes = [4, 68], strides = [1, 1]} : vector<4x256xf32> to vector<4x68xf32>
    %184 = vector.extract_strided_slice %182 {offsets = [0, 0], sizes = [4, 188], strides = [1, 1]} : vector<4x256xf32> to vector<4x188xf32>
    %185 = tpu.concatenate %183, %184 in 1 : vector<4x68xf32>, vector<4x188xf32> -> vector<4x256xf32>
    %186 = vector.extract_strided_slice %2 {offsets = [0, 0], sizes = [1, 256], strides = [1, 1]} : vector<25x256xf32> to vector<1x256xf32>
    %187 = vector.broadcast %186 : vector<1x256xf32> to vector<4x256xf32>
    %188 = arith.mulf %185, %187 : vector<4x256xf32>
    %c0_36 = arith.constant 0 : index
    %c256 = arith.constant 256 : index
    %189 = vector.load %arg6[%c0_36, %c256] : memref<128x512xf32, #tpu.memory_space<vmem>>, vector<4x256xf32>
    tpu.vector_store %arg6[%c0_36, %c256], %188 {strides = array<i32>} : memref<128x512xf32, #tpu.memory_space<vmem>>, vector<4x256xf32>,
    %190 = vector.extract_strided_slice %182 {offsets = [0, 190], sizes = [4, 66], strides = [1, 1]} : vector<4x256xf32> to vector<4x66xf32>
    %191 = vector.extract_strided_slice %182 {offsets = [0, 0], sizes = [4, 190], strides = [1, 1]} : vector<4x256xf32> to vector<4x190xf32>
    %192 = tpu.concatenate %190, %191 in 1 : vector<4x66xf32>, vector<4x190xf32> -> vector<4x256xf32>
    %193 = vector.extract_strided_slice %2 {offsets = [1, 0], sizes = [1, 256], strides = [1, 1]} : vector<25x256xf32> to vector<1x256xf32>
    %194 = vector.broadcast %193 : vector<1x256xf32> to vector<4x256xf32>
    %195 = arith.mulf %192, %194 : vector<4x256xf32>
    %c4_37 = arith.constant 4 : index
    %c256_38 = arith.constant 256 : index
    %196 = vector.load %arg6[%c4_37, %c256_38] : memref<128x512xf32, #tpu.memory_space<vmem>>, vector<4x256xf32>
    tpu.vector_store %arg6[%c4_37, %c256_38], %195 {strides = array<i32>} : memref<128x512xf32, #tpu.memory_space<vmem>>, vector<4x256xf32>,
    %197 = vector.extract_strided_slice %182 {offsets = [0, 192], sizes = [4, 64], strides = [1, 1]} : vector<4x256xf32> to vector<4x64xf32>
    %198 = vector.extract_strided_slice %182 {offsets = [0, 0], sizes = [4, 192], strides = [1, 1]} : vector<4x256xf32> to vector<4x192xf32>
    %199 = tpu.concatenate %197, %198 in 1 : vector<4x64xf32>, vector<4x192xf32> -> vector<4x256xf32>
    %200 = vector.extract_strided_slice %2 {offsets = [2, 0], sizes = [1, 256], strides = [1, 1]} : vector<25x256xf32> to vector<1x256xf32>
    %201 = vector.broadcast %200 : vector<1x256xf32> to vector<4x256xf32>
    %202 = arith.mulf %199, %201 : vector<4x256xf32>
    %c8_39 = arith.constant 8 : index
    %c256_40 = arith.constant 256 : index
    %203 = vector.load %arg6[%c8_39, %c256_40] : memref<128x512xf32, #tpu.memory_space<vmem>>, vector<4x256xf32>
    tpu.vector_store %arg6[%c8_39, %c256_40], %202 {strides = array<i32>} : memref<128x512xf32, #tpu.memory_space<vmem>>, vector<4x256xf32>,
    %204 = vector.extract_strided_slice %182 {offsets = [0, 194], sizes = [4, 62], strides = [1, 1]} : vector<4x256xf32> to vector<4x62xf32>
    %205 = vector.extract_strided_slice %182 {offsets = [0, 0], sizes = [4, 194], strides = [1, 1]} : vector<4x256xf32> to vector<4x194xf32>
    %206 = tpu.concatenate %204, %205 in 1 : vector<4x62xf32>, vector<4x194xf32> -> vector<4x256xf32>
    %207 = vector.extract_strided_slice %2 {offsets = [3, 0], sizes = [1, 256], strides = [1, 1]} : vector<25x256xf32> to vector<1x256xf32>
    %208 = vector.broadcast %207 : vector<1x256xf32> to vector<4x256xf32>
    %209 = arith.mulf %206, %208 : vector<4x256xf32>
    %c12_41 = arith.constant 12 : index
    %c256_42 = arith.constant 256 : index
    %210 = vector.load %arg6[%c12_41, %c256_42] : memref<128x512xf32, #tpu.memory_space<vmem>>, vector<4x256xf32>
    tpu.vector_store %arg6[%c12_41, %c256_42], %209 {strides = array<i32>} : memref<128x512xf32, #tpu.memory_space<vmem>>, vector<4x256xf32>,
    %211 = vector.extract_strided_slice %182 {offsets = [0, 196], sizes = [4, 60], strides = [1, 1]} : vector<4x256xf32> to vector<4x60xf32>
    %212 = vector.extract_strided_slice %182 {offsets = [0, 0], sizes = [4, 196], strides = [1, 1]} : vector<4x256xf32> to vector<4x196xf32>
    %213 = tpu.concatenate %211, %212 in 1 : vector<4x60xf32>, vector<4x196xf32> -> vector<4x256xf32>
    %214 = vector.extract_strided_slice %2 {offsets = [4, 0], sizes = [1, 256], strides = [1, 1]} : vector<25x256xf32> to vector<1x256xf32>
    %215 = vector.broadcast %214 : vector<1x256xf32> to vector<4x256xf32>
    %216 = arith.mulf %213, %215 : vector<4x256xf32>
    %c16_43 = arith.constant 16 : index
    %c256_44 = arith.constant 256 : index
    %217 = vector.load %arg6[%c16_43, %c256_44] : memref<128x512xf32, #tpu.memory_space<vmem>>, vector<4x256xf32>
    tpu.vector_store %arg6[%c16_43, %c256_44], %216 {strides = array<i32>} : memref<128x512xf32, #tpu.memory_space<vmem>>, vector<4x256xf32>,
    %218 = vector.extract_strided_slice %182 {offsets = [0, 220], sizes = [4, 36], strides = [1, 1]} : vector<4x256xf32> to vector<4x36xf32>
    %219 = vector.extract_strided_slice %182 {offsets = [0, 0], sizes = [4, 220], strides = [1, 1]} : vector<4x256xf32> to vector<4x220xf32>
    %220 = tpu.concatenate %218, %219 in 1 : vector<4x36xf32>, vector<4x220xf32> -> vector<4x256xf32>
    %221 = vector.extract_strided_slice %2 {offsets = [5, 0], sizes = [1, 256], strides = [1, 1]} : vector<25x256xf32> to vector<1x256xf32>
    %222 = vector.broadcast %221 : vector<1x256xf32> to vector<4x256xf32>
    %223 = arith.mulf %220, %222 : vector<4x256xf32>
    %c20_45 = arith.constant 20 : index
    %c256_46 = arith.constant 256 : index
    %224 = vector.load %arg6[%c20_45, %c256_46] : memref<128x512xf32, #tpu.memory_space<vmem>>, vector<4x256xf32>
    tpu.vector_store %arg6[%c20_45, %c256_46], %223 {strides = array<i32>} : memref<128x512xf32, #tpu.memory_space<vmem>>, vector<4x256xf32>,
    %225 = vector.extract_strided_slice %182 {offsets = [0, 222], sizes = [4, 34], strides = [1, 1]} : vector<4x256xf32> to vector<4x34xf32>
    %226 = vector.extract_strided_slice %182 {offsets = [0, 0], sizes = [4, 222], strides = [1, 1]} : vector<4x256xf32> to vector<4x222xf32>
    %227 = tpu.concatenate %225, %226 in 1 : vector<4x34xf32>, vector<4x222xf32> -> vector<4x256xf32>
    %228 = vector.extract_strided_slice %2 {offsets = [6, 0], sizes = [1, 256], strides = [1, 1]} : vector<25x256xf32> to vector<1x256xf32>
    %229 = vector.broadcast %228 : vector<1x256xf32> to vector<4x256xf32>
    %230 = arith.mulf %227, %229 : vector<4x256xf32>
    %c24_47 = arith.constant 24 : index
    %c256_48 = arith.constant 256 : index
    %231 = vector.load %arg6[%c24_47, %c256_48] : memref<128x512xf32, #tpu.memory_space<vmem>>, vector<4x256xf32>
    tpu.vector_store %arg6[%c24_47, %c256_48], %230 {strides = array<i32>} : memref<128x512xf32, #tpu.memory_space<vmem>>, vector<4x256xf32>,
    %232 = vector.extract_strided_slice %182 {offsets = [0, 224], sizes = [4, 32], strides = [1, 1]} : vector<4x256xf32> to vector<4x32xf32>
    %233 = vector.extract_strided_slice %182 {offsets = [0, 0], sizes = [4, 224], strides = [1, 1]} : vector<4x256xf32> to vector<4x224xf32>
    %234 = tpu.concatenate %232, %233 in 1 : vector<4x32xf32>, vector<4x224xf32> -> vector<4x256xf32>
    %235 = vector.extract_strided_slice %2 {offsets = [7, 0], sizes = [1, 256], strides = [1, 1]} : vector<25x256xf32> to vector<1x256xf32>
    %236 = vector.broadcast %235 : vector<1x256xf32> to vector<4x256xf32>
    %237 = arith.mulf %234, %236 : vector<4x256xf32>
    %c28_49 = arith.constant 28 : index
    %c256_50 = arith.constant 256 : index
    %238 = vector.load %arg6[%c28_49, %c256_50] : memref<128x512xf32, #tpu.memory_space<vmem>>, vector<4x256xf32>
    tpu.vector_store %arg6[%c28_49, %c256_50], %237 {strides = array<i32>} : memref<128x512xf32, #tpu.memory_space<vmem>>, vector<4x256xf32>,
    %239 = vector.extract_strided_slice %182 {offsets = [0, 226], sizes = [4, 30], strides = [1, 1]} : vector<4x256xf32> to vector<4x30xf32>
    %240 = vector.extract_strided_slice %182 {offsets = [0, 0], sizes = [4, 226], strides = [1, 1]} : vector<4x256xf32> to vector<4x226xf32>
    %241 = tpu.concatenate %239, %240 in 1 : vector<4x30xf32>, vector<4x226xf32> -> vector<4x256xf32>
    %242 = vector.extract_strided_slice %2 {offsets = [8, 0], sizes = [1, 256], strides = [1, 1]} : vector<25x256xf32> to vector<1x256xf32>
    %243 = vector.broadcast %242 : vector<1x256xf32> to vector<4x256xf32>
    %244 = arith.mulf %241, %243 : vector<4x256xf32>
    %c32_51 = arith.constant 32 : index
    %c256_52 = arith.constant 256 : index
    %245 = vector.load %arg6[%c32_51, %c256_52] : memref<128x512xf32, #tpu.memory_space<vmem>>, vector<4x256xf32>
    tpu.vector_store %arg6[%c32_51, %c256_52], %244 {strides = array<i32>} : memref<128x512xf32, #tpu.memory_space<vmem>>, vector<4x256xf32>,
    %246 = vector.extract_strided_slice %182 {offsets = [0, 228], sizes = [4, 28], strides = [1, 1]} : vector<4x256xf32> to vector<4x28xf32>
    %247 = vector.extract_strided_slice %182 {offsets = [0, 0], sizes = [4, 228], strides = [1, 1]} : vector<4x256xf32> to vector<4x228xf32>
    %248 = tpu.concatenate %246, %247 in 1 : vector<4x28xf32>, vector<4x228xf32> -> vector<4x256xf32>
    %249 = vector.extract_strided_slice %2 {offsets = [9, 0], sizes = [1, 256], strides = [1, 1]} : vector<25x256xf32> to vector<1x256xf32>
    %250 = vector.broadcast %249 : vector<1x256xf32> to vector<4x256xf32>
    %251 = arith.mulf %248, %250 : vector<4x256xf32>
    %c36_53 = arith.constant 36 : index
    %c256_54 = arith.constant 256 : index
    %252 = vector.load %arg6[%c36_53, %c256_54] : memref<128x512xf32, #tpu.memory_space<vmem>>, vector<4x256xf32>
    tpu.vector_store %arg6[%c36_53, %c256_54], %251 {strides = array<i32>} : memref<128x512xf32, #tpu.memory_space<vmem>>, vector<4x256xf32>,
    %253 = vector.extract_strided_slice %182 {offsets = [0, 252], sizes = [4, 4], strides = [1, 1]} : vector<4x256xf32> to vector<4x4xf32>
    %254 = vector.extract_strided_slice %182 {offsets = [0, 0], sizes = [4, 252], strides = [1, 1]} : vector<4x256xf32> to vector<4x252xf32>
    %255 = tpu.concatenate %253, %254 in 1 : vector<4x4xf32>, vector<4x252xf32> -> vector<4x256xf32>
    %256 = vector.extract_strided_slice %2 {offsets = [10, 0], sizes = [1, 256], strides = [1, 1]} : vector<25x256xf32> to vector<1x256xf32>
    %257 = vector.broadcast %256 : vector<1x256xf32> to vector<4x256xf32>
    %258 = arith.mulf %255, %257 : vector<4x256xf32>
    %c40_55 = arith.constant 40 : index
    %c256_56 = arith.constant 256 : index
    %259 = vector.load %arg6[%c40_55, %c256_56] : memref<128x512xf32, #tpu.memory_space<vmem>>, vector<4x256xf32>
    tpu.vector_store %arg6[%c40_55, %c256_56], %258 {strides = array<i32>} : memref<128x512xf32, #tpu.memory_space<vmem>>, vector<4x256xf32>,
    %260 = vector.extract_strided_slice %182 {offsets = [0, 254], sizes = [4, 2], strides = [1, 1]} : vector<4x256xf32> to vector<4x2xf32>
    %261 = vector.extract_strided_slice %182 {offsets = [0, 0], sizes = [4, 254], strides = [1, 1]} : vector<4x256xf32> to vector<4x254xf32>
    %262 = tpu.concatenate %260, %261 in 1 : vector<4x2xf32>, vector<4x254xf32> -> vector<4x256xf32>
    %263 = vector.extract_strided_slice %2 {offsets = [11, 0], sizes = [1, 256], strides = [1, 1]} : vector<25x256xf32> to vector<1x256xf32>
    %264 = vector.broadcast %263 : vector<1x256xf32> to vector<4x256xf32>
    %265 = arith.mulf %262, %264 : vector<4x256xf32>
    %c44_57 = arith.constant 44 : index
    %c256_58 = arith.constant 256 : index
    %266 = vector.load %arg6[%c44_57, %c256_58] : memref<128x512xf32, #tpu.memory_space<vmem>>, vector<4x256xf32>
    tpu.vector_store %arg6[%c44_57, %c256_58], %265 {strides = array<i32>} : memref<128x512xf32, #tpu.memory_space<vmem>>, vector<4x256xf32>,
    %267 = vector.extract_strided_slice %2 {offsets = [12, 0], sizes = [1, 256], strides = [1, 1]} : vector<25x256xf32> to vector<1x256xf32>
    %268 = vector.broadcast %267 : vector<1x256xf32> to vector<4x256xf32>
    %269 = arith.mulf %182, %268 : vector<4x256xf32>
    %c48_59 = arith.constant 48 : index
    %c256_60 = arith.constant 256 : index
    %270 = vector.load %arg6[%c48_59, %c256_60] : memref<128x512xf32, #tpu.memory_space<vmem>>, vector<4x256xf32>
    tpu.vector_store %arg6[%c48_59, %c256_60], %269 {strides = array<i32>} : memref<128x512xf32, #tpu.memory_space<vmem>>, vector<4x256xf32>,
    %271 = vector.extract_strided_slice %182 {offsets = [0, 2], sizes = [4, 254], strides = [1, 1]} : vector<4x256xf32> to vector<4x254xf32>
    %272 = vector.extract_strided_slice %182 {offsets = [0, 0], sizes = [4, 2], strides = [1, 1]} : vector<4x256xf32> to vector<4x2xf32>
    %273 = tpu.concatenate %271, %272 in 1 : vector<4x254xf32>, vector<4x2xf32> -> vector<4x256xf32>
    %274 = vector.extract_strided_slice %2 {offsets = [13, 0], sizes = [1, 256], strides = [1, 1]} : vector<25x256xf32> to vector<1x256xf32>
    %275 = vector.broadcast %274 : vector<1x256xf32> to vector<4x256xf32>
    %276 = arith.mulf %273, %275 : vector<4x256xf32>
    %c52_61 = arith.constant 52 : index
    %c256_62 = arith.constant 256 : index
    %277 = vector.load %arg6[%c52_61, %c256_62] : memref<128x512xf32, #tpu.memory_space<vmem>>, vector<4x256xf32>
    tpu.vector_store %arg6[%c52_61, %c256_62], %276 {strides = array<i32>} : memref<128x512xf32, #tpu.memory_space<vmem>>, vector<4x256xf32>,
    %278 = vector.extract_strided_slice %182 {offsets = [0, 4], sizes = [4, 252], strides = [1, 1]} : vector<4x256xf32> to vector<4x252xf32>
    %279 = vector.extract_strided_slice %182 {offsets = [0, 0], sizes = [4, 4], strides = [1, 1]} : vector<4x256xf32> to vector<4x4xf32>
    %280 = tpu.concatenate %278, %279 in 1 : vector<4x252xf32>, vector<4x4xf32> -> vector<4x256xf32>
    %281 = vector.extract_strided_slice %2 {offsets = [14, 0], sizes = [1, 256], strides = [1, 1]} : vector<25x256xf32> to vector<1x256xf32>
    %282 = vector.broadcast %281 : vector<1x256xf32> to vector<4x256xf32>
    %283 = arith.mulf %280, %282 : vector<4x256xf32>
    %c56_63 = arith.constant 56 : index
    %c256_64 = arith.constant 256 : index
    %284 = vector.load %arg6[%c56_63, %c256_64] : memref<128x512xf32, #tpu.memory_space<vmem>>, vector<4x256xf32>
    tpu.vector_store %arg6[%c56_63, %c256_64], %283 {strides = array<i32>} : memref<128x512xf32, #tpu.memory_space<vmem>>, vector<4x256xf32>,
    %285 = vector.extract_strided_slice %182 {offsets = [0, 28], sizes = [4, 228], strides = [1, 1]} : vector<4x256xf32> to vector<4x228xf32>
    %286 = vector.extract_strided_slice %182 {offsets = [0, 0], sizes = [4, 28], strides = [1, 1]} : vector<4x256xf32> to vector<4x28xf32>
    %287 = tpu.concatenate %285, %286 in 1 : vector<4x228xf32>, vector<4x28xf32> -> vector<4x256xf32>
    %288 = vector.extract_strided_slice %2 {offsets = [15, 0], sizes = [1, 256], strides = [1, 1]} : vector<25x256xf32> to vector<1x256xf32>
    %289 = vector.broadcast %288 : vector<1x256xf32> to vector<4x256xf32>
    %290 = arith.mulf %287, %289 : vector<4x256xf32>
    %c60_65 = arith.constant 60 : index
    %c256_66 = arith.constant 256 : index
    %291 = vector.load %arg6[%c60_65, %c256_66] : memref<128x512xf32, #tpu.memory_space<vmem>>, vector<4x256xf32>
    tpu.vector_store %arg6[%c60_65, %c256_66], %290 {strides = array<i32>} : memref<128x512xf32, #tpu.memory_space<vmem>>, vector<4x256xf32>,
    %292 = vector.extract_strided_slice %182 {offsets = [0, 30], sizes = [4, 226], strides = [1, 1]} : vector<4x256xf32> to vector<4x226xf32>
    %293 = vector.extract_strided_slice %182 {offsets = [0, 0], sizes = [4, 30], strides = [1, 1]} : vector<4x256xf32> to vector<4x30xf32>
    %294 = tpu.concatenate %292, %293 in 1 : vector<4x226xf32>, vector<4x30xf32> -> vector<4x256xf32>
    %295 = vector.extract_strided_slice %2 {offsets = [16, 0], sizes = [1, 256], strides = [1, 1]} : vector<25x256xf32> to vector<1x256xf32>
    %296 = vector.broadcast %295 : vector<1x256xf32> to vector<4x256xf32>
    %297 = arith.mulf %294, %296 : vector<4x256xf32>
    %c64_67 = arith.constant 64 : index
    %c256_68 = arith.constant 256 : index
    %298 = vector.load %arg6[%c64_67, %c256_68] : memref<128x512xf32, #tpu.memory_space<vmem>>, vector<4x256xf32>
    tpu.vector_store %arg6[%c64_67, %c256_68], %297 {strides = array<i32>} : memref<128x512xf32, #tpu.memory_space<vmem>>, vector<4x256xf32>,
    %299 = vector.extract_strided_slice %182 {offsets = [0, 32], sizes = [4, 224], strides = [1, 1]} : vector<4x256xf32> to vector<4x224xf32>
    %300 = vector.extract_strided_slice %182 {offsets = [0, 0], sizes = [4, 32], strides = [1, 1]} : vector<4x256xf32> to vector<4x32xf32>
    %301 = tpu.concatenate %299, %300 in 1 : vector<4x224xf32>, vector<4x32xf32> -> vector<4x256xf32>
    %302 = vector.extract_strided_slice %2 {offsets = [17, 0], sizes = [1, 256], strides = [1, 1]} : vector<25x256xf32> to vector<1x256xf32>
    %303 = vector.broadcast %302 : vector<1x256xf32> to vector<4x256xf32>
    %304 = arith.mulf %301, %303 : vector<4x256xf32>
    %c68_69 = arith.constant 68 : index
    %c256_70 = arith.constant 256 : index
    %305 = vector.load %arg6[%c68_69, %c256_70] : memref<128x512xf32, #tpu.memory_space<vmem>>, vector<4x256xf32>
    tpu.vector_store %arg6[%c68_69, %c256_70], %304 {strides = array<i32>} : memref<128x512xf32, #tpu.memory_space<vmem>>, vector<4x256xf32>,
    %306 = vector.extract_strided_slice %182 {offsets = [0, 34], sizes = [4, 222], strides = [1, 1]} : vector<4x256xf32> to vector<4x222xf32>
    %307 = vector.extract_strided_slice %182 {offsets = [0, 0], sizes = [4, 34], strides = [1, 1]} : vector<4x256xf32> to vector<4x34xf32>
    %308 = tpu.concatenate %306, %307 in 1 : vector<4x222xf32>, vector<4x34xf32> -> vector<4x256xf32>
    %309 = vector.extract_strided_slice %2 {offsets = [18, 0], sizes = [1, 256], strides = [1, 1]} : vector<25x256xf32> to vector<1x256xf32>
    %310 = vector.broadcast %309 : vector<1x256xf32> to vector<4x256xf32>
    %311 = arith.mulf %308, %310 : vector<4x256xf32>
    %c72_71 = arith.constant 72 : index
    %c256_72 = arith.constant 256 : index
    %312 = vector.load %arg6[%c72_71, %c256_72] : memref<128x512xf32, #tpu.memory_space<vmem>>, vector<4x256xf32>
    tpu.vector_store %arg6[%c72_71, %c256_72], %311 {strides = array<i32>} : memref<128x512xf32, #tpu.memory_space<vmem>>, vector<4x256xf32>,
    %313 = vector.extract_strided_slice %182 {offsets = [0, 36], sizes = [4, 220], strides = [1, 1]} : vector<4x256xf32> to vector<4x220xf32>
    %314 = vector.extract_strided_slice %182 {offsets = [0, 0], sizes = [4, 36], strides = [1, 1]} : vector<4x256xf32> to vector<4x36xf32>
    %315 = tpu.concatenate %313, %314 in 1 : vector<4x220xf32>, vector<4x36xf32> -> vector<4x256xf32>
    %316 = vector.extract_strided_slice %2 {offsets = [19, 0], sizes = [1, 256], strides = [1, 1]} : vector<25x256xf32> to vector<1x256xf32>
    %317 = vector.broadcast %316 : vector<1x256xf32> to vector<4x256xf32>
    %318 = arith.mulf %315, %317 : vector<4x256xf32>
    %c76_73 = arith.constant 76 : index
    %c256_74 = arith.constant 256 : index
    %319 = vector.load %arg6[%c76_73, %c256_74] : memref<128x512xf32, #tpu.memory_space<vmem>>, vector<4x256xf32>
    tpu.vector_store %arg6[%c76_73, %c256_74], %318 {strides = array<i32>} : memref<128x512xf32, #tpu.memory_space<vmem>>, vector<4x256xf32>,
    %320 = vector.extract_strided_slice %182 {offsets = [0, 60], sizes = [4, 196], strides = [1, 1]} : vector<4x256xf32> to vector<4x196xf32>
    %321 = vector.extract_strided_slice %182 {offsets = [0, 0], sizes = [4, 60], strides = [1, 1]} : vector<4x256xf32> to vector<4x60xf32>
    %322 = tpu.concatenate %320, %321 in 1 : vector<4x196xf32>, vector<4x60xf32> -> vector<4x256xf32>
    %323 = vector.extract_strided_slice %2 {offsets = [20, 0], sizes = [1, 256], strides = [1, 1]} : vector<25x256xf32> to vector<1x256xf32>
    %324 = vector.broadcast %323 : vector<1x256xf32> to vector<4x256xf32>
    %325 = arith.mulf %322, %324 : vector<4x256xf32>
    %c80_75 = arith.constant 80 : index
    %c256_76 = arith.constant 256 : index
    %326 = vector.load %arg6[%c80_75, %c256_76] : memref<128x512xf32, #tpu.memory_space<vmem>>, vector<4x256xf32>
    tpu.vector_store %arg6[%c80_75, %c256_76], %325 {strides = array<i32>} : memref<128x512xf32, #tpu.memory_space<vmem>>, vector<4x256xf32>,
    %327 = vector.extract_strided_slice %182 {offsets = [0, 62], sizes = [4, 194], strides = [1, 1]} : vector<4x256xf32> to vector<4x194xf32>
    %328 = vector.extract_strided_slice %182 {offsets = [0, 0], sizes = [4, 62], strides = [1, 1]} : vector<4x256xf32> to vector<4x62xf32>
    %329 = tpu.concatenate %327, %328 in 1 : vector<4x194xf32>, vector<4x62xf32> -> vector<4x256xf32>
    %330 = vector.extract_strided_slice %2 {offsets = [21, 0], sizes = [1, 256], strides = [1, 1]} : vector<25x256xf32> to vector<1x256xf32>
    %331 = vector.broadcast %330 : vector<1x256xf32> to vector<4x256xf32>
    %332 = arith.mulf %329, %331 : vector<4x256xf32>
    %c84_77 = arith.constant 84 : index
    %c256_78 = arith.constant 256 : index
    %333 = vector.load %arg6[%c84_77, %c256_78] : memref<128x512xf32, #tpu.memory_space<vmem>>, vector<4x256xf32>
    tpu.vector_store %arg6[%c84_77, %c256_78], %332 {strides = array<i32>} : memref<128x512xf32, #tpu.memory_space<vmem>>, vector<4x256xf32>,
    %334 = vector.extract_strided_slice %182 {offsets = [0, 64], sizes = [4, 192], strides = [1, 1]} : vector<4x256xf32> to vector<4x192xf32>
    %335 = vector.extract_strided_slice %182 {offsets = [0, 0], sizes = [4, 64], strides = [1, 1]} : vector<4x256xf32> to vector<4x64xf32>
    %336 = tpu.concatenate %334, %335 in 1 : vector<4x192xf32>, vector<4x64xf32> -> vector<4x256xf32>
    %337 = vector.extract_strided_slice %2 {offsets = [22, 0], sizes = [1, 256], strides = [1, 1]} : vector<25x256xf32> to vector<1x256xf32>
    %338 = vector.broadcast %337 : vector<1x256xf32> to vector<4x256xf32>
    %339 = arith.mulf %336, %338 : vector<4x256xf32>
    %c88_79 = arith.constant 88 : index
    %c256_80 = arith.constant 256 : index
    %340 = vector.load %arg6[%c88_79, %c256_80] : memref<128x512xf32, #tpu.memory_space<vmem>>, vector<4x256xf32>
    tpu.vector_store %arg6[%c88_79, %c256_80], %339 {strides = array<i32>} : memref<128x512xf32, #tpu.memory_space<vmem>>, vector<4x256xf32>,
    %341 = vector.extract_strided_slice %182 {offsets = [0, 66], sizes = [4, 190], strides = [1, 1]} : vector<4x256xf32> to vector<4x190xf32>
    %342 = vector.extract_strided_slice %182 {offsets = [0, 0], sizes = [4, 66], strides = [1, 1]} : vector<4x256xf32> to vector<4x66xf32>
    %343 = tpu.concatenate %341, %342 in 1 : vector<4x190xf32>, vector<4x66xf32> -> vector<4x256xf32>
    %344 = vector.extract_strided_slice %2 {offsets = [23, 0], sizes = [1, 256], strides = [1, 1]} : vector<25x256xf32> to vector<1x256xf32>
    %345 = vector.broadcast %344 : vector<1x256xf32> to vector<4x256xf32>
    %346 = arith.mulf %343, %345 : vector<4x256xf32>
    %c92_81 = arith.constant 92 : index
    %c256_82 = arith.constant 256 : index
    %347 = vector.load %arg6[%c92_81, %c256_82] : memref<128x512xf32, #tpu.memory_space<vmem>>, vector<4x256xf32>
    tpu.vector_store %arg6[%c92_81, %c256_82], %346 {strides = array<i32>} : memref<128x512xf32, #tpu.memory_space<vmem>>, vector<4x256xf32>,
    %348 = vector.extract_strided_slice %182 {offsets = [0, 68], sizes = [4, 188], strides = [1, 1]} : vector<4x256xf32> to vector<4x188xf32>
    %349 = vector.extract_strided_slice %182 {offsets = [0, 0], sizes = [4, 68], strides = [1, 1]} : vector<4x256xf32> to vector<4x68xf32>
    %350 = tpu.concatenate %348, %349 in 1 : vector<4x188xf32>, vector<4x68xf32> -> vector<4x256xf32>
    %351 = vector.extract_strided_slice %2 {offsets = [24, 0], sizes = [1, 256], strides = [1, 1]} : vector<25x256xf32> to vector<1x256xf32>
    %352 = vector.broadcast %351 : vector<1x256xf32> to vector<4x256xf32>
    %353 = arith.mulf %350, %352 : vector<4x256xf32>
    %c96_83 = arith.constant 96 : index
    %c256_84 = arith.constant 256 : index
    %354 = vector.load %arg6[%c96_83, %c256_84] : memref<128x512xf32, #tpu.memory_space<vmem>>, vector<4x256xf32>
    tpu.vector_store %arg6[%c96_83, %c256_84], %353 {strides = array<i32>} : memref<128x512xf32, #tpu.memory_space<vmem>>, vector<4x256xf32>,
    %c0_85 = arith.constant 0 : index
    %c0_86 = arith.constant 0 : index
    %355 = vector.load %arg2[%c0_85, %c0_86] : memref<8x128xf32, #tpu.memory_space<vmem>>, vector<8x128xf32>
    %c0_87 = arith.constant 0 : index
    %c0_88 = arith.constant 0 : index
    %356 = vector.load %arg6[%c0_87, %c0_88] : memref<128x512xf32, #tpu.memory_space<vmem>>, vector<128x512xf32>
    %cst_89 = arith.constant dense<0.000000e+00> : vector<8x512xf32>
    %357 = tpu.matmul %355, %356, %cst_89 {dimension_numbers = #tpu.dot_dimension_numbers<[1], [0], [0], [1], [0, 0, 1, 1], [], []>} : vector<8x128xf32>, vector<128x512xf32>, vector<8x512xf32> -> vector<8x512xf32>
    %c0_90 = arith.constant 0 : index
    %c0_91 = arith.constant 0 : index
    %358 = vector.load %arg4[%c0_90, %c0_91] : memref<8x512xf32, #tpu.memory_space<vmem>>, vector<8x512xf32>
    tpu.vector_store %arg4[%c0_90, %c0_91], %357 {strides = array<i32>} : memref<8x512xf32, #tpu.memory_space<vmem>>, vector<8x512xf32>,
    %cst_92 = arith.constant dense<0.000000e+00> : vector<8xf32>
    %359 = vector.multi_reduction <add>, %357, %cst_92 [1] : vector<8x512xf32> to vector<8xf32>
    %360 = vector.shape_cast %359 : vector<8xf32> to vector<8x1xf32>
    %361 = arith.mulf %357, %357 : vector<8x512xf32>
    %cst_93 = arith.constant dense<0.000000e+00> : vector<8xf32>
    %362 = vector.multi_reduction <add>, %361, %cst_93 [1] : vector<8x512xf32> to vector<8xf32>
    %363 = vector.shape_cast %362 : vector<8xf32> to vector<8x1xf32>
    %364 = tpu.concatenate %360, %363 in 1 : vector<8x1xf32>, vector<8x1xf32> -> vector<8x2xf32>
    %c0_94 = arith.constant 0 : index
    %c0_95 = arith.constant 0 : index
    %c0_96 = arith.constant 0 : index
    %365 = vector.load %arg5[%c0_94, %c0_95, %c0_96] : memref<1x8x2xf32, #tpu.memory_space<vmem>>, vector<1x8x2xf32>
    %366 = vector.shape_cast %365 : vector<1x8x2xf32> to vector<8x2xf32>
    %367 = vector.shape_cast %364 : vector<8x2xf32> to vector<1x8x2xf32>
    tpu.vector_store %arg5[%c0_94, %c0_95, %c0_96], %367 {strides = array<i32>} : memref<1x8x2xf32, #tpu.memory_space<vmem>>, vector<1x8x2xf32>,
    return
  }
  func.func @transform_0(%arg0: i32) -> (i32, i32, i32) {
    %c0_i32 = arith.constant 0 : i32
    %c0_i32_0 = arith.constant 0 : i32
    %c0_i32_1 = arith.constant 0 : i32
    return %arg0, %c0_i32, %c0_i32_0 : i32, i32, i32
  }
  func.func @transform_1(%arg0: i32) -> (i32, i32) {
    %c0_i32 = arith.constant 0 : i32
    %c0_i32_0 = arith.constant 0 : i32
    %c0_i32_1 = arith.constant 0 : i32
    return %c0_i32, %c0_i32_0 : i32, i32
  }
  func.func @transform_2(%arg0: i32) -> (i32, i32) {
    %c0_i32 = arith.constant 0 : i32
    %c0_i32_0 = arith.constant 0 : i32
    %c0_i32_1 = arith.constant 0 : i32
    return %c0_i32, %c0_i32_0 : i32, i32
  }
  func.func @transform_3(%arg0: i32) -> (i32, i32) {
    %c0_i32 = arith.constant 0 : i32
    %c0_i32_0 = arith.constant 0 : i32
    return %c0_i32, %arg0 : i32, i32
  }
  func.func @transform_4(%arg0: i32) -> (i32, i32, i32) {
    %c0_i32 = arith.constant 0 : i32
    %c0_i32_0 = arith.constant 0 : i32
    %c0_i32_1 = arith.constant 0 : i32
    return %arg0, %c0_i32, %c0_i32_0 : i32, i32, i32
  }
}

</mosaic_0001>

<bundles_post_ra>
// kernel: dilconv_mixture_forward.3
= control target key start
LH: loop header
LB: loop body
LE: loop exit
PB: predicated region body
PF: predicated region fallthrough
CT: control target
= control target key end

     0   :  { %v51_v0 = vmov 0   ;;  %s102_s1 = inlined_call_operand.vmem [shape: f32[8,1], index: 1, kind: input, shape index: {}]   ;;  %s103_s2 = inlined_call_operand.vmem [shape: f32[8,1], index: 2, kind: input, shape index: {}]   ;;  %s104_s0 = inlined_call_operand.vmem [shape: f32[8,512], index: 0, kind: input, shape index: {}]   ;;  %s105_s3 = inlined_call_operand.vmem [shape: f32[2,8,256], index: 3, kind: output, shape index: {}]  }
   0x1   :  { %50 = vset.pattern.permute.xlu0 %v51_v0  ;;  %v14_v1 = vld [vmem:[%s102_s1] sm:$0xff]  ;;  %v17_v5 = vld [vmem:[%s104_s0 + $0x8] sm:$0xff]  ;;  %v34_v6 = vld [vmem:[%s104_s0 + $0x10] sm:$0xff] }
   0x2   :  { %20 = vperm.xlu0 %50, %v14_v1   ;;  %v15_v2 = vld [vmem:[%s103_s2] sm:$0xff]  ;;  %v35_v7 = vld [vmem:[%s104_s0 + $0x18] sm:$0xff] }
   0x3   :  { %v16_v3 = vld [vmem:[%s104_s0] sm:$0xff] }
   0x6   :  { %27 = vperm.xlu0 %50, %v15_v2  }
  0x7d   :  { %v21_v4 = vpop.permute.xlu0 %20 }
  0x7e   :  { %v23_v8 = vmul.f32 %v21_v4, %v16_v3  ;;  %v24_v9 = vmul.f32 %v21_v4, %v17_v5  ;;  %v36_v10 = vmul.f32 %v34_v6, %v21_v4  ;;  %v37_v11 = vmul.f32 %v35_v7, %v21_v4 }
  0x81   :  { %v28_v12 = vpop.permute.xlu0 %27 }
  0x82   :  { %v30_v13 = vadd.f32 %v28_v12, %v23_v8  ;;  %v31_v14 = vadd.f32 %v28_v12, %v24_v9  ;;  %v38_v15 = vadd.f32 %v36_v10, %v28_v12  ;;  %v39_v16 = vadd.f32 %v37_v11, %v28_v12 }
  0x84   :  { %32 = vst [vmem:[%s105_s3] sm:$0xff] %v30_v13  ;;  %33 = vst [vmem:[%s105_s3 + $0x8] sm:$0xff] %v31_v14 }
  0x85   :  { %47 = vst [vmem:[%s105_s3 + $0x10] sm:$0xff] %v38_v15  ;;  %48 = vst [vmem:[%s105_s3 + $0x18] sm:$0xff] %v39_v16 }

// kernel: dilconv_mixture_forward.2
= control target key start
LH: loop header
LB: loop body
LE: loop exit
PB: predicated region body
PF: predicated region fallthrough
CT: control target
= control target key end

     0   :  { %v54_v0 = vlaneseq  ;;  %v1221_v2 = vmov 0.0   ;;  %s1222_s17 = smov 60   ;;  %s1223_s18 = smov 62   ;;  %vm149_vm0 = vcmask 490496   ;;  %vm121_vm1 = vcmask 506880   ;;  %s1863_s0 = inlined_call_operand.vmem [shape: f32[2,4,256], index: 0, kind: input, shape index: {}]   ;;  %s1864_s2 = inlined_call_operand.vmem [shape: f32[25,256], index: 2, kind: input, shape index: {}]   ;;  %s1865_s1 = inlined_call_operand.vmem [shape: f32[8,128], index: 1, kind: input, shape index: {}]   ;;  %s1866_s3 = inlined_call_operand.vmem [shape: f32[8,512], index: 3, kind: output, shape index: {0}]   ;;  %s1867_s4 = inlined_call_operand.vmem [shape: f32[1,8,2], index: 4, kind: output, shape index: {1}]  }
   0x1   :  { %v40_v1 = vld [vmem:[%s1863_s0] sm:$0xff]  ;;  %16 = vst [vmem:[#allocation2 + $0x60] sm:$0xff] %v1221_v2  ;;  %17 = vst [vmem:[#allocation2 + $0xf0] sm:$0xff] %v1221_v2  ;;  %1027 = vmatprep.subr.mxu0 %v1221_v2  ;;  %1098 = vmatprep.subr.mxu1 %v1221_v2  ;;  %v1296_v8 = vld [vmem:[%s1864_s2 + $0x28] sm:$0xff]  ;;  %s1224_s23 = smov 66   ;;  %s1225_s24 = smov 64  }
   0x2   :  { %18 = vst [vmem:[#allocation2 + $0xa8] sm:$0xff] %v1221_v2  ;;  %19 = vst [vmem:[#allocation2 + $0x198] sm:$0xff] %v1221_v2  ;;  %v1269_v3 = vmax.f32 %v40_v1, 0.0  ;;  %1028 = vmatpush1.msra.mxu0 %v1221_v2  ;;  %1099 = vmatpush1.msra.mxu1 %v1221_v2  ;;  %v1271_v4 = vshrl.u32 %v54_v0, 7  ;;  %v1291_v7 = vld [vmem:[%s1864_s2 + $0x20] sm:$0xff]  ;;  %v1200_v14 = vld [vmem:[%s1863_s0 + $0x8] sm:$0xff] }
   0x3   :  { %1029 = vmatprep.subr.mxu0 %v1221_v2  ;;  %1100 = vmatprep.subr.mxu1 %v1221_v2  ;;  %s1226_s27 = smov 68   ;;  %v1328_v15 = vmax.f32 %v1200_v14, 0.0  ;;  %s1227_s28 = smov 92   ;;  %v1361_v17 = vld [vmem:[%s1864_s2 + $0x10] sm:$0xff]  ;;  %v1366_v18 = vld [vmem:[%s1864_s2 + $0x18] sm:$0xff]  ;;  %v1441_v28 = vld [vmem:[%s1864_s2] sm:$0xff] }
   0x4   :  { %147 = vrot.lane.b32.xlu1 %v1269_v3, %s1222_s17  ;;  %119 = vrot.lane.b32.xlu0 %v1269_v3, %s1223_s18  ;;  %v1279_v5 = vcombine.high %v1269_v3, %v1269_v3  ;;  %v1282_v6 = vsub.s32 4, %v1271_v4  ;;  %v1299_v9 = vsub.s32 3, %v1271_v4  ;;  %s1228_s0 = smov 96   ;;  %s1229_s29 = smov 94   ;;  %v1446_v29 = vld [vmem:[%s1864_s2 + $0x8] sm:$0xff]  ;;  %v1449_v30 = vsub.s32 7, %v1271_v4 }
   0x5   :  { %1030 = vmatpush1.msra.mxu0 %v1221_v2  ;;  %1101 = vmatpush1.msra.mxu1 %v1221_v2  ;;  %v1336_v16 = vcombine.high %v1328_v15, %v1328_v15  ;;  %s1230_s8 = smov 100   ;;  %s1231_s9 = smov 98   ;;  %v1452_v31 = vsub.s32 1, %v1271_v4  ;;  %v1455_v34 = vsub.s32 5, %v1271_v4  ;;  %vm71_vm2 = vcmask 539648  }
   0x6   :  { %1031 = vmatprep.subr.mxu0 %v1221_v2  ;;  %v1303_v10 = vrot.slane %v1291_v7, %v1282_v6  ;;  %v1307_v11 = vrot.slane %v1296_v8, %v1282_v6  ;;  %1102 = vmatprep.subr.mxu1 %v1221_v2  ;;  %v1311_v12 = vrot.slane %v1291_v7, %v1299_v9  ;;  %s1232_s10 = smov 126   ;;  %s1233_s11 = smov 124   ;;  %v1480_v39 = vld [vmem:[%s1864_s2 + $0x30] ss:$0 sm:$0xff]  ;;  %v1485_v40 = vld [vmem:[%s1864_s2 + $0x38] ss:$0 sm:$0xff] }
   0x7   :  { %1032 = vmatpush1.msra.mxu0 %v1221_v2  ;;  %1091 = vmatprep.mubr.f32.mxu0 %v1221_v2  ;;  %v1317_v13 = vrot.slane %v1296_v8, %v1299_v9  ;;  %v347_v19 = vrot.slane %v1361_v17, %v1282_v6  ;;  %v351_v20 = vrot.slane %v1366_v18, %v1282_v6  ;;  %s1234_s12 = smov 2   ;;  %s1235_s13 = smov 28   ;;  %v1512_v49 = vsub.s32 2, %v1271_v4 }
   0x8   :  { %144 = vrot.lane.b32.xlu1 %v1279_v5, %s1222_s17  ;;  %116 = vrot.lane.b32.xlu0 %v1279_v5, %s1223_s18  ;;  %v1391_v24 = vrot.slane %v1361_v17, %v1299_v9  ;;  %v1395_v25 = vrot.slane %v1366_v18, %v1299_v9  ;;  %s1236_s14 = smov 4   ;;  %s1237_s15 = smov 32   ;;  %v1459_v35 = vrot.slane %v1441_v28, %v1282_v6  ;;  %v1515_v50 = vsub.s32 6, %v1271_v4 }
   0x9   :  { %1103 = vmatpush1.msra.mxu1 %v1221_v2  ;;  %1162 = vmatprep.mubr.f32.mxu1 %v1221_v2  ;;  %v354_v21 = vcombine.low %v347_v19, %v351_v20  ;;  %s1238_s16 = smov 30   ;;  %v1467_v36 = vrot.slane %v1446_v29, %v1282_v6  ;;  %v1471_v37 = vrot.slane %v1441_v28, %v1299_v9  ;;  %s1239_s2 = smov 36   ;;  %vm99_vm3 = vcmask 523264  }
   0xa   :  { %v1475_v38 = vrot.slane %v1446_v29, %v1299_v9  ;;  %v1489_v41 = vrot.slane %v1291_v7, %v1449_v30  ;;  %v1493_v42 = vrot.slane %v1296_v8, %v1449_v30  ;;  %v1497_v43 = vrot.slane %v1441_v28, %v1452_v31  ;;  %s1240_s25 = smov 34  }
   0xb   :  { %v356_v22 = vmul.f32 %v354_v21, %v1269_v3  ;;  %v809_v26 = vmul.f32 %v1328_v15, %v354_v21  ;;  %v1501_v44 = vrot.slane %v1446_v29, %v1452_v31  ;;  %v1505_v47 = vrot.slane %v1291_v7, %v1455_v34 }
   0xc   :  { %69 = vrot.lane.b32.xlu1 %v1269_v3, %s1224_s23  ;;  %66 = vrot.lane.b32.xlu0 %v1279_v5, %s1224_s23  ;;  %v1509_v48 = vrot.slane %v1296_v8, %v1455_v34  ;;  %v1535_v1 = vrot.slane %v1441_v28, %v1512_v49  ;;  %v1539_v2 = vrot.slane %v1446_v29, %v1512_v49  ;;  %v1542_v6 = vsub.s32 0, %v1271_v4 }
   0xd   :  { %v358_v23 = vcombine.high %v356_v22, %v356_v22  ;;  %360 = vst [vmem:[#allocation2 + $0x150] sm:$0xf] %v356_v22  ;;  %v811_v27 = vcombine.high %v809_v26, %v809_v26  ;;  %813 = vst [vmem:[#allocation2 + $0x70] sm:$0xf] %v809_v26  ;;  %v1554_v4 = vrot.slane %v1296_v8, %v1515_v50  ;;  %vm49_vm4 = vcmask 556032  }
   0xe   :  { %vm516_vm5 = vcmask 752640   ;;  %vm466_vm6 = vcmask 785408   ;;  %vm494_vm7 = vcmask 769024   ;;  %vm416_vm8 = vcmask 818176  }
   0xf   :  { %361 = vst [vmem:[#allocation2 + $0x180] sm:$0xf] %v358_v23  ;;  %814 = vst [vmem:[#allocation2 + $0x78] sm:$0xf] %v811_v27  ;;  %v1550_v23 = vrot.slane %v1291_v7, %v1515_v50  ;;  %vm444_vm9 = vcmask 801792   ;;  %vm366_vm10 = vcmask 1031168  }
  0x10   :  { %97 = vrot.lane.b32.xlu1 %v1269_v3, %s1225_s24  ;;  %94 = vrot.lane.b32.xlu0 %v1279_v5, %s1225_s24  ;;  %vm394_vm11 = vcmask 1014784   ;;  %vm321_vm12 = vcmask 15360   ;;  %vm271_vm13 = vcmask 228352   ;;  %vm299_vm14 = vcmask 31744  }
  0x11   :  { %vm221_vm15 = vcmask 261120  }
  0x14   :  { %47 = vrot.lane.b32.xlu1 %v1269_v3, %s1226_s27  ;;  %44 = vrot.lane.b32.xlu0 %v1279_v5, %s1226_s27 }
  0x18   :  { %514 = vrot.lane.b32.xlu1 %v1279_v5, %s1227_s28  ;;  %512 = vrot.lane.b32.xlu0 %v1269_v3, %s1227_s28 }
  0x1c   :  { %665 = vrot.lane.b32.xlu1 %v1328_v15, %s1223_s18  ;;  %662 = vrot.lane.b32.xlu0 %v1336_v16, %s1223_s18 }
  0x20   :  { %684 = vrot.lane.b32.xlu1 %v1328_v15, %s1222_s17  ;;  %681 = vrot.lane.b32.xlu0 %v1336_v16, %s1222_s17 }
  0x24   :  { %464 = vrot.lane.b32.xlu1 %v1279_v5, %s1228_s0  ;;  %462 = vrot.lane.b32.xlu0 %v1269_v3, %s1228_s0 }
  0x28   :  { %492 = vrot.lane.b32.xlu1 %v1279_v5, %s1229_s29  ;;  %490 = vrot.lane.b32.xlu0 %v1269_v3, %s1229_s29 }
  0x2c   :  { %633 = vrot.lane.b32.xlu1 %v1328_v15, %s1224_s23  ;;  %630 = vrot.lane.b32.xlu0 %v1336_v16, %s1224_s23 }
  0x30   :  { %652 = vrot.lane.b32.xlu1 %v1328_v15, %s1225_s24  ;;  %649 = vrot.lane.b32.xlu0 %v1336_v16, %s1225_s24 }
  0x34   :  { %414 = vrot.lane.b32.xlu1 %v1279_v5, %s1230_s8  ;;  %412 = vrot.lane.b32.xlu0 %v1269_v3, %s1230_s8 }
  0x38   :  { %442 = vrot.lane.b32.xlu1 %v1279_v5, %s1231_s9  ;;  %440 = vrot.lane.b32.xlu0 %v1269_v3, %s1231_s9 }
  0x3c   :  { %620 = vrot.lane.b32.xlu1 %v1328_v15, %s1226_s27  ;;  %617 = vrot.lane.b32.xlu0 %v1336_v16, %s1226_s27 }
  0x40   :  { %913 = vrot.lane.b32.xlu1 %v1336_v16, %s1227_s28  ;;  %911 = vrot.lane.b32.xlu0 %v1328_v15, %s1227_s28 }
  0x44   :  { %364 = vrot.lane.b32.xlu1 %v1279_v5, %s1232_s10  ;;  %362 = vrot.lane.b32.xlu0 %v1269_v3, %s1232_s10 }
  0x48   :  { %392 = vrot.lane.b32.xlu1 %v1279_v5, %s1233_s11  ;;  %390 = vrot.lane.b32.xlu0 %v1269_v3, %s1233_s11 }
  0x4c   :  { %881 = vrot.lane.b32.xlu1 %v1336_v16, %s1228_s0  ;;  %879 = vrot.lane.b32.xlu0 %v1328_v15, %s1228_s0 }
  0x50   :  { %900 = vrot.lane.b32.xlu1 %v1336_v16, %s1229_s29  ;;  %898 = vrot.lane.b32.xlu0 %v1328_v15, %s1229_s29 }
  0x54   :  { %319 = vrot.lane.b32.xlu1 %v1269_v3, %s1234_s12  ;;  %316 = vrot.lane.b32.xlu0 %v1279_v5, %s1234_s12 }
  0x58   :  { %849 = vrot.lane.b32.xlu1 %v1336_v16, %s1230_s8  ;;  %847 = vrot.lane.b32.xlu0 %v1328_v15, %s1230_s8 }
  0x5c   :  { %868 = vrot.lane.b32.xlu1 %v1336_v16, %s1231_s9  ;;  %866 = vrot.lane.b32.xlu0 %v1328_v15, %s1231_s9 }
  0x60   :  { %269 = vrot.lane.b32.xlu1 %v1269_v3, %s1235_s13  ;;  %266 = vrot.lane.b32.xlu0 %v1279_v5, %s1235_s13 }
  0x64   :  { %297 = vrot.lane.b32.xlu1 %v1269_v3, %s1236_s14  ;;  %294 = vrot.lane.b32.xlu0 %v1279_v5, %s1236_s14 }
  0x68   :  { %817 = vrot.lane.b32.xlu1 %v1336_v16, %s1232_s10  ;;  %815 = vrot.lane.b32.xlu0 %v1328_v15, %s1232_s10 }
  0x6c   :  { %836 = vrot.lane.b32.xlu1 %v1336_v16, %s1233_s11  ;;  %834 = vrot.lane.b32.xlu0 %v1328_v15, %s1233_s11 }
  0x70   :  { %219 = vrot.lane.b32.xlu1 %v1269_v3, %s1237_s15  ;;  %216 = vrot.lane.b32.xlu0 %v1279_v5, %s1237_s15 }
  0x74   :  { %247 = vrot.lane.b32.xlu1 %v1269_v3, %s1238_s16  ;;  %244 = vrot.lane.b32.xlu0 %v1279_v5, %s1238_s16 }
  0x76   :  { %v148_v32 = vpop.permute.xlu1 %147  ;;  %v120_v33 = vpop.permute.xlu0 %119 }
  0x78   :  { %793 = vrot.lane.b32.xlu1 %v1328_v15, %s1234_s12  ;;  %790 = vrot.lane.b32.xlu0 %v1336_v16, %s1234_s12 }
  0x7a   :  { %v145_v45 = vpop.permute.xlu1 %144  ;;  %v117_v46 = vpop.permute.xlu0 %116 }
  0x7b   :  { %v150_v51 = vsel %vm149_vm0, %v148_v32, %v145_v45  ;;  %v153_v52 = vsel %vm149_vm0, %v145_v45, %v148_v32  ;;  %v122_v53 = vsel %vm121_vm1, %v120_v33, %v117_v46  ;;  %v125_v54 = vsel %vm121_vm1, %v117_v46, %v120_v33 }
  0x7c   :  { %v162_v55 = vmul.f32 %v1459_v35, %v153_v52  ;;  %v163_v56 = vmul.f32 %v1467_v36, %v150_v51  ;;  %v608_v57 = vmul.f32 %v1480_v39, %v150_v51  ;;  %v609_v58 = vmul.f32 %v1485_v40, %v153_v52  ;;  %169 = vrot.lane.b32.xlu1 %v1269_v3, %s1239_s2 }
  0x7d   :  { %v134_v59 = vmul.f32 %v1471_v37, %v125_v54  ;;  %v135_v60 = vmul.f32 %v1475_v38, %v122_v53  ;;  %v590_v61 = vmul.f32 %v1489_v41, %v122_v53  ;;  %v591_v62 = vmul.f32 %v1493_v42, %v125_v54  ;;  %166 = vrot.lane.b32.xlu0 %v1279_v5, %s1239_s2 }
  0x7e   :  { %164 = vst [vmem:[#allocation2] sm:$0xf] %v162_v55  ;;  %165 = vst [vmem:[#allocation2 + $0xd8] sm:$0xf] %v163_v56  ;;  %v70_v63 = vpop.permute.xlu1 %69  ;;  %v67_v0 = vpop.permute.xlu0 %66  ;;  %v1568_v56 = vrot.slane %v1441_v28, %v1542_v6 }
  0x7f   :  { %610 = vst [vmem:[#allocation2 + $0x60] sm:$0xf] %v608_v57  ;;  %611 = vst [vmem:[#allocation2 + $0xf0] sm:$0xf] %v609_v58  ;;  %v138_v9 = vrot.slane %v134_v59, 4  ;;  %v139_v14 = vrot.slane %v135_v60, 4  ;;  %v72_v21 = vsel %vm71_vm2, %v70_v63, %v67_v0  ;;  %v75_v22 = vsel %vm71_vm2, %v67_v0, %v70_v63 }
  0x80   :  { %v594_v19 = vrot.slane %v590_v61, 4  ;;  %v595_v20 = vrot.slane %v591_v62, 4  ;;  %197 = vrot.lane.b32.xlu1 %v1269_v3, %s1240_s25  ;;  %v84_v26 = vmul.f32 %v1497_v43, %v75_v22  ;;  %v85_v27 = vmul.f32 %v1501_v44, %v72_v21 }
  0x81   :  { %142 = vst [vmem:[#allocation2 + $0x168] sm:$0xf0] %v138_v9  ;;  %143 = vst [vmem:[#allocation2 + $0x10] sm:$0xf0] %v139_v14  ;;  %v560_v32 = vmul.f32 %v1505_v47, %v72_v21  ;;  %v561_v3 = vmul.f32 %v1509_v48, %v75_v22  ;;  %194 = vrot.lane.b32.xlu0 %v1279_v5, %s1240_s25  ;;  %v1572_v5 = vrot.slane %v1446_v29, %v1542_v6 }
  0x82   :  { %598 = vst [vmem:[#allocation2 + $0x1a0] sm:$0xf0] %v594_v19  ;;  %599 = vst [vmem:[#allocation2 + $0x148] sm:$0xf0] %v595_v20  ;;  %v98_v33 = vpop.permute.xlu1 %97  ;;  %v95_v45 = vpop.permute.xlu0 %94  ;;  %v88_v46 = vrot.slane %v84_v26, 4  ;;  %v89_v51 = vrot.slane %v85_v27, 4 }
  0x83   :  { %v564_v52 = vrot.slane %v560_v32, 4  ;;  %v565_v53 = vrot.slane %v561_v3, 4  ;;  %v100_v54 = vsel %vm99_vm3, %v98_v33, %v95_v45  ;;  %v103_v55 = vsel %vm99_vm3, %v95_v45, %v98_v33 }
  0x84   :  { %761 = vrot.lane.b32.xlu1 %v1328_v15, %s1235_s13  ;;  %92 = vst [vmem:[#allocation2 + $0xc0] sm:$0xf0] %v88_v46  ;;  %93 = vst [vmem:[#allocation2 + $0x98] sm:$0xf0] %v89_v51  ;;  %v112_v57 = vmul.f32 %v1535_v1, %v103_v55  ;;  %v113_v58 = vmul.f32 %v1539_v2, %v100_v54  ;;  %v578_v59 = vmul.f32 %v1550_v23, %v100_v54 }
  0x85   :  { %568 = vst [vmem:[#allocation2 + $0x1c0] sm:$0xf0] %v564_v52  ;;  %569 = vst [vmem:[#allocation2 + $0x178] sm:$0xf0] %v565_v53  ;;  %v579_v60 = vmul.f32 %v1554_v4, %v103_v55  ;;  %758 = vrot.lane.b32.xlu0 %v1336_v16, %s1235_s13 }
  0x86   :  { %v1012_v61 = vld [vmem:[#allocation2 + $0xf0] sm:$0xff]  ;;  %v1011_v62 = vld [vmem:[#allocation2 + $0x60] sm:$0xff]  ;;  %v48_v63 = vpop.permute.xlu1 %47  ;;  %v45_v0 = vpop.permute.xlu0 %44  ;;  %114 = vst [vmem:[#allocation2 + $0x168] sm:$0xf] %v112_v57  ;;  %115 = vst [vmem:[#allocation2 + $0x10] sm:$0xf] %v113_v58 }
  0x87   :  { %1033 = vmatprep.subr.mxu0 %v1012_v61  ;;  %580 = vst [vmem:[#allocation2 + $0x1a0] sm:$0xf] %v578_v59  ;;  %581 = vst [vmem:[#allocation2 + $0x148] sm:$0xf] %v579_v60  ;;  %v50_v9 = vsel %vm49_vm4, %v48_v63, %v45_v0  ;;  %v53_v14 = vsel %vm49_vm4, %v45_v0, %v48_v63 }
  0x88   :  { %1034 = vmatpush1.msra.mxu0 %v1011_v62  ;;  %v62_v19 = vmul.f32 %v1568_v56, %v53_v14  ;;  %v63_v20 = vmul.f32 %v1572_v5, %v50_v9  ;;  %v548_v21 = vmul.f32 %v1303_v10, %v50_v9  ;;  %v549_v22 = vmul.f32 %v1307_v11, %v53_v14 }
  0x89   :  { %780 = vrot.lane.b32.xlu1 %v1328_v15, %s1236_s14  ;;  %777 = vrot.lane.b32.xlu0 %v1336_v16, %s1236_s14 }
  0x8a   :  { %64 = vst [vmem:[#allocation2 + $0xc0] sm:$0xf] %v62_v19  ;;  %65 = vst [vmem:[#allocation2 + $0x98] sm:$0xf] %v63_v20  ;;  %v515_v26 = vpop.permute.xlu1 %514  ;;  %v513_v27 = vpop.permute.xlu0 %512 }
  0x8b   :  { %550 = vst [vmem:[#allocation2 + $0x1c0] sm:$0xf] %v548_v21  ;;  %551 = vst [vmem:[#allocation2 + $0x178] sm:$0xf] %v549_v22  ;;  %v517_v32 = vsel %vm516_vm5, %v513_v27, %v515_v26  ;;  %v521_v3 = vsel %vm516_vm5, %v515_v26, %v513_v27  ;;  %v1612_v21 = vrot.slane %v1291_v7, %v1452_v31 }
  0x8c   :  { %v530_v33 = vmul.f32 %v1311_v12, %v517_v32  ;;  %v531_v45 = vmul.f32 %v1317_v13, %v521_v3  ;;  %v1616_v22 = vrot.slane %v1296_v8, %v1452_v31 }
  0x8d   :  { %729 = vrot.lane.b32.xlu1 %v1328_v15, %s1237_s15  ;;  %726 = vrot.lane.b32.xlu0 %v1336_v16, %s1237_s15 }
  0x8e   :  { %v534_v46 = vrot.slane %v530_v33, 4  ;;  %v535_v51 = vrot.slane %v531_v45, 4  ;;  %v666_v52 = vpop.permute.xlu1 %665  ;;  %v1008_v53 = vld [vmem:[#allocation2 + $0x148] sm:$0xff]  ;;  %v663_v54 = vpop.permute.xlu0 %662  ;;  %v1007_v55 = vld [vmem:[#allocation2 + $0x1a0] sm:$0xff] }
  0x8f   :  { %1035 = vmatprep.subr.mxu0 %v1008_v53  ;;  %v667_v57 = vsel %vm121_vm1, %v666_v52, %v663_v54  ;;  %v670_v58 = vsel %vm121_vm1, %v663_v54, %v666_v52  ;;  %vm171_vm1 = vcmask 293888  }
  0x90   :  { %538 = vst [vmem:[#allocation2 + $0x100] sm:$0xf0] %v534_v46  ;;  %539 = vst [vmem:[#allocation2 + $0x88] sm:$0xf0] %v535_v51  ;;  %v671_v59 = vmul.f32 %v670_v58, %v1471_v37  ;;  %v672_v60 = vmul.f32 %v667_v57, %v1475_v38  ;;  %v948_v61 = vmul.f32 %v667_v57, %v1489_v41  ;;  %1036 = vmatpush1.msra.mxu0 %v1007_v55 }
  0x91   :  { %v949_v62 = vmul.f32 %v670_v58, %v1493_v42  ;;  %748 = vrot.lane.b32.xlu1 %v1328_v15, %s1238_s16  ;;  %745 = vrot.lane.b32.xlu0 %v1336_v16, %s1238_s16  ;;  %v1632_v46 = vrot.slane %v1291_v7, %v1512_v49  ;;  %v1636_v51 = vrot.slane %v1296_v8, %v1512_v49 }
  0x92   :  { %v1004_v63 = vld [vmem:[#allocation2 + $0x178] sm:$0xff]  ;;  %v1003_v0 = vld [vmem:[#allocation2 + $0x1c0] sm:$0xff]  ;;  %v675_v9 = vrot.slane %v671_v59, 4  ;;  %v676_v14 = vrot.slane %v672_v60, 4  ;;  %v952_v19 = vrot.slane %v948_v61, 4  ;;  %v685_v20 = vpop.permute.xlu1 %684  ;;  %v682_v38 = vpop.permute.xlu0 %681 }
  0x93   :  { %v953_v37 = vrot.slane %v949_v62, 4  ;;  %1037 = vmatprep.subr.mxu0 %v1004_v63  ;;  %v686_v41 = vsel %vm149_vm0, %v685_v20, %v682_v38  ;;  %v689_v42 = vsel %vm149_vm0, %v682_v38, %v685_v20  ;;  %vm249_vm0 = vcmask 244736  }
  0x94   :  { %1038 = vmatpush1.msra.mxu0 %v1003_v0  ;;  %679 = vst [vmem:[#allocation2 + $0xc8] sm:$0xf0] %v675_v9  ;;  %680 = vst [vmem:[#allocation2 + $0x1f8] sm:$0xf0] %v676_v14  ;;  %v690_v26 = vmul.f32 %v689_v42, %v1459_v35  ;;  %v691_v27 = vmul.f32 %v686_v41, %v1467_v36  ;;  %v958_v32 = vmul.f32 %v1480_v39, %v686_v41 }
  0x95   :  { %956 = vst [vmem:[#allocation2 + $0x1d8] sm:$0xf0] %v952_v19  ;;  %957 = vst [vmem:[#allocation2 + $0x40] sm:$0xf0] %v953_v37  ;;  %v959_v3 = vmul.f32 %v1485_v40, %v689_v42  ;;  %697 = vrot.lane.b32.xlu1 %v1328_v15, %s1239_s2  ;;  %694 = vrot.lane.b32.xlu0 %v1336_v16, %s1239_s2 }
  0x96   :  { %692 = vst [vmem:[#allocation2 + $0x1f0] sm:$0xf] %v690_v26  ;;  %693 = vst [vmem:[#allocation2 + $0x20] sm:$0xf] %v691_v27  ;;  %v465_v33 = vpop.permute.xlu1 %464  ;;  %v463_v45 = vpop.permute.xlu0 %462 }
  0x97   :  { %960 = vst [vmem:[#allocation2 + $0xa8] sm:$0xf] %v958_v32  ;;  %961 = vst [vmem:[#allocation2 + $0x198] sm:$0xf] %v959_v3  ;;  %v467_v35 = vsel %vm466_vm6, %v463_v45, %v465_v33  ;;  %v471_v36 = vsel %vm466_vm6, %v465_v33, %v463_v45 }
  0x98   :  { %v480_v39 = vmul.f32 %v1612_v21, %v467_v35  ;;  %v481_v40 = vmul.f32 %v1616_v22, %v471_v36 }
  0x99   :  { %716 = vrot.lane.b32.xlu1 %v1328_v15, %s1240_s25  ;;  %713 = vrot.lane.b32.xlu0 %v1336_v16, %s1240_s25 }
  0x9a   :  { %v484_v52 = vrot.slane %v480_v39, 4  ;;  %v485_v53 = vrot.slane %v481_v40, 4  ;;  %v493_v54 = vpop.permute.xlu1 %492  ;;  %v491_v55 = vpop.permute.xlu0 %490 }
  0x9b   :  { %v495_v57 = vsel %vm494_vm7, %v491_v55, %v493_v54  ;;  %v499_v58 = vsel %vm494_vm7, %v493_v54, %v491_v55 }
  0x9c   :  { %488 = vst [vmem:[#allocation2 + $0x18] sm:$0xf0] %v484_v52  ;;  %489 = vst [vmem:[#allocation2 + $0x130] sm:$0xf0] %v485_v53  ;;  %v508_v59 = vmul.f32 %v1632_v46, %v495_v57  ;;  %v509_v60 = vmul.f32 %v1636_v51, %v499_v58 }
  0x9e   :  { %v1014_v61 = vld [vmem:[#allocation2 + $0x198] sm:$0xff]  ;;  %v1013_v62 = vld [vmem:[#allocation2 + $0xa8] sm:$0xff]  ;;  %510 = vst [vmem:[#allocation2 + $0x100] sm:$0xf] %v508_v59  ;;  %511 = vst [vmem:[#allocation2 + $0x88] sm:$0xf] %v509_v60  ;;  %v634_v15 = vpop.permute.xlu1 %633  ;;  %v631_v16 = vpop.permute.xlu0 %630 }
  0x9f   :  { %1104 = vmatprep.subr.mxu1 %v1014_v61  ;;  %v635_v63 = vsel %vm71_vm2, %v634_v15, %v631_v16  ;;  %v638_v0 = vsel %vm71_vm2, %v631_v16, %v634_v15  ;;  %vm199_vm2 = vcmask 277504  }
  0xa0   :  { %1105 = vmatpush1.msra.mxu1 %v1013_v62  ;;  %v639_v9 = vmul.f32 %v638_v0, %v1497_v43  ;;  %v640_v14 = vmul.f32 %v635_v63, %v1501_v44  ;;  %v934_v19 = vmul.f32 %v635_v63, %v1505_v47  ;;  %v935_v37 = vmul.f32 %v638_v0, %v1509_v48 }
  0xa1   :  { %v1656_v43 = vrot.slane %v1361_v17, %v1449_v30  ;;  %v1660_v44 = vrot.slane %v1366_v18, %v1449_v30 }
  0xa2   :  { %v643_v20 = vrot.slane %v639_v9, 4  ;;  %v644_v38 = vrot.slane %v640_v14, 4  ;;  %v938_v41 = vrot.slane %v934_v19, 4  ;;  %v939_v42 = vrot.slane %v935_v37, 4  ;;  %v653_v26 = vpop.permute.xlu1 %652  ;;  %v650_v27 = vpop.permute.xlu0 %649 }
  0xa3   :  { %v654_v32 = vsel %vm99_vm3, %v653_v26, %v650_v27  ;;  %v657_v3 = vsel %vm99_vm3, %v650_v27, %v653_v26  ;;  %vm1187_vm3 = vcmask 7168  }
  0xa4   :  { %647 = vst [vmem:[#allocation2 + $0xd0] sm:$0xf0] %v643_v20  ;;  %648 = vst [vmem:[#allocation2 + $0x170] sm:$0xf0] %v644_v38  ;;  %v658_v47 = vmul.f32 %v657_v3, %v1535_v1  ;;  %v659_v48 = vmul.f32 %v654_v32, %v1539_v2  ;;  %v944_v33 = vmul.f32 %v654_v32, %v1550_v23 }
  0xa5   :  { %942 = vst [vmem:[#allocation2 + $0x38] sm:$0xf0] %v938_v41  ;;  %943 = vst [vmem:[#allocation2 + $0x190] sm:$0xf0] %v939_v42  ;;  %v945_v45 = vmul.f32 %v657_v3, %v1554_v4  ;;  %v1000_v35 = vld [vmem:[#allocation2 + $0x88] sm:$0xff]  ;;  %v999_v36 = vld [vmem:[#allocation2 + $0x100] sm:$0xff]  ;;  %v1672_v23 = vrot.slane %v1291_v7, %v1542_v6  ;;  %v1676_v4 = vrot.slane %v1296_v8, %v1542_v6 }
  0xa6   :  { %660 = vst [vmem:[#allocation2 + $0xc8] sm:$0xf] %v658_v47  ;;  %661 = vst [vmem:[#allocation2 + $0x1f8] sm:$0xf] %v659_v48  ;;  %v415_v39 = vpop.permute.xlu1 %414  ;;  %1039 = vmatprep.subr.mxu0 %v1000_v35  ;;  %v413_v40 = vpop.permute.xlu0 %412  ;;  %v1706_v35 = vrot.slane %v1361_v17, %v1515_v50 }
  0xa7   :  { %946 = vst [vmem:[#allocation2 + $0x1d8] sm:$0xf] %v944_v33  ;;  %947 = vst [vmem:[#allocation2 + $0x40] sm:$0xf] %v945_v45  ;;  %v417_v52 = vsel %vm416_vm8, %v413_v40, %v415_v39  ;;  %v421_v53 = vsel %vm416_vm8, %v415_v39, %v413_v40  ;;  %1040 = vmatpush1.msra.mxu0 %v999_v36  ;;  %v1710_v36 = vrot.slane %v1366_v18, %v1515_v50 }
  0xa8   :  { %v430_v1 = vmul.f32 %v1656_v43, %v417_v52  ;;  %v431_v2 = vmul.f32 %v1660_v44, %v421_v53 }
  0xaa   :  { %v434_v54 = vrot.slane %v430_v1, 4  ;;  %v435_v55 = vrot.slane %v431_v2, 4  ;;  %v443_v57 = vpop.permute.xlu1 %442  ;;  %v441_v58 = vpop.permute.xlu0 %440 }
  0xab   :  { %v445_v59 = vsel %vm444_vm9, %v441_v58, %v443_v57  ;;  %v449_v60 = vsel %vm444_vm9, %v443_v57, %v441_v58 }
  0xac   :  { %438 = vst [vmem:[#allocation2 + $0xe0] sm:$0xf0] %v434_v54  ;;  %439 = vst [vmem:[#allocation2 + $0x188] sm:$0xf0] %v435_v55  ;;  %v458_v61 = vmul.f32 %v1672_v23, %v445_v59  ;;  %v459_v62 = vmul.f32 %v1676_v4, %v449_v60 }
  0xae   :  { %v1010_v7 = vld [vmem:[#allocation2 + $0x40] sm:$0xff]  ;;  %v1009_v15 = vld [vmem:[#allocation2 + $0x1d8] sm:$0xff]  ;;  %460 = vst [vmem:[#allocation2 + $0x18] sm:$0xf] %v458_v61  ;;  %461 = vst [vmem:[#allocation2 + $0x130] sm:$0xf] %v459_v62  ;;  %v621_v8 = vpop.permute.xlu1 %620  ;;  %v618_v16 = vpop.permute.xlu0 %617 }
  0xaf   :  { %1106 = vmatprep.subr.mxu1 %v1010_v7  ;;  %v622_v63 = vsel %vm49_vm4, %v621_v8, %v618_v16  ;;  %v625_v0 = vsel %vm49_vm4, %v618_v16, %v621_v8 }
  0xb0   :  { %1107 = vmatpush1.msra.mxu1 %v1009_v15  ;;  %v626_v9 = vmul.f32 %v625_v0, %v1568_v56  ;;  %v627_v14 = vmul.f32 %v622_v63, %v1572_v5  ;;  %v930_v19 = vmul.f32 %v622_v63, %v1303_v10  ;;  %v931_v37 = vmul.f32 %v625_v0, %v1307_v11 }
  0xb1   :  { %v1694_v10 = vrot.slane %v1361_v17, %v1455_v34  ;;  %v1698_v11 = vrot.slane %v1366_v18, %v1455_v34 }
  0xb2   :  { %628 = vst [vmem:[#allocation2 + $0xd0] sm:$0xf] %v626_v9  ;;  %629 = vst [vmem:[#allocation2 + $0x170] sm:$0xf] %v627_v14  ;;  %v914_v20 = vpop.permute.xlu1 %913  ;;  %v912_v38 = vpop.permute.xlu0 %911 }
  0xb3   :  { %932 = vst [vmem:[#allocation2 + $0x38] sm:$0xf] %v930_v19  ;;  %933 = vst [vmem:[#allocation2 + $0x190] sm:$0xf] %v931_v37  ;;  %v915_v41 = vsel %vm516_vm5, %v912_v38, %v914_v20  ;;  %v919_v42 = vsel %vm516_vm5, %v914_v20, %v912_v38 }
  0xb4   :  { %v920_v26 = vmul.f32 %v915_v41, %v1311_v12  ;;  %v921_v56 = vmul.f32 %v919_v42, %v1317_v13 }
  0xb5   :  { %v996_v5 = vld [vmem:[#allocation2 + $0x130] sm:$0xff]  ;;  %v995_v27 = vld [vmem:[#allocation2 + $0x18] sm:$0xff] }
  0xb6   :  { %v924_v32 = vrot.slane %v920_v26, 4  ;;  %v925_v3 = vrot.slane %v921_v56, 4  ;;  %v365_v47 = vpop.permute.xlu1 %364  ;;  %1041 = vmatprep.subr.mxu0 %v996_v5  ;;  %v363_v48 = vpop.permute.xlu0 %362 }
  0xb7   :  { %v367_v33 = vsel %vm366_vm10, %v363_v48, %v365_v47  ;;  %v371_v12 = vsel %vm366_vm10, %v365_v47, %v363_v48  ;;  %1042 = vmatpush1.msra.mxu0 %v995_v27 }
  0xb8   :  { %928 = vst [vmem:[#allocation2 + $0x80] sm:$0xf0] %v924_v32  ;;  %929 = vst [vmem:[#allocation2 + $0x110] sm:$0xf0] %v925_v3  ;;  %v380_v13 = vmul.f32 %v1694_v10, %v367_v33  ;;  %v381_v45 = vmul.f32 %v1698_v11, %v371_v12 }
  0xba   :  { %v1006_v39 = vld [vmem:[#allocation2 + $0x190] sm:$0xff]  ;;  %v1005_v40 = vld [vmem:[#allocation2 + $0x38] sm:$0xff]  ;;  %v384_v52 = vrot.slane %v380_v13, 4  ;;  %v385_v53 = vrot.slane %v381_v45, 4  ;;  %v393_v1 = vpop.permute.xlu1 %392  ;;  %v391_v2 = vpop.permute.xlu0 %390 }
  0xbb   :  { %1108 = vmatprep.subr.mxu1 %v1006_v39  ;;  %v395_v54 = vsel %vm394_vm11, %v391_v2, %v393_v1  ;;  %v399_v55 = vsel %vm394_vm11, %v393_v1, %v391_v2 }
  0xbc   :  { %1109 = vmatpush1.msra.mxu1 %v1005_v40  ;;  %388 = vst [vmem:[#allocation2 + $0x150] sm:$0xf0] %v384_v52  ;;  %389 = vst [vmem:[#allocation2 + $0x180] sm:$0xf0] %v385_v53  ;;  %v408_v57 = vmul.f32 %v1706_v35, %v395_v54  ;;  %v409_v58 = vmul.f32 %v1710_v36, %v399_v55  ;;  %v1742_v55 = vrot.slane %v1366_v18, %v1452_v31 }
  0xbe   :  { %410 = vst [vmem:[#allocation2 + $0xe0] sm:$0xf] %v408_v57  ;;  %411 = vst [vmem:[#allocation2 + $0x188] sm:$0xf] %v409_v58  ;;  %v882_v59 = vpop.permute.xlu1 %881  ;;  %v880_v60 = vpop.permute.xlu0 %879 }
  0xbf   :  { %v883_v61 = vsel %vm466_vm6, %v880_v60, %v882_v59  ;;  %v887_v62 = vsel %vm466_vm6, %v882_v59, %v880_v60 }
  0xc0   :  { %v888_v7 = vmul.f32 %v883_v61, %v1612_v21  ;;  %v889_v15 = vmul.f32 %v887_v62, %v1616_v22  ;;  %v1750_v61 = vrot.slane %v1361_v17, %v1512_v49 }
  0xc2   :  { %v892_v8 = vrot.slane %v888_v7, 4  ;;  %v893_v16 = vrot.slane %v889_v15, 4  ;;  %v901_v63 = vpop.permute.xlu1 %900  ;;  %v899_v0 = vpop.permute.xlu0 %898 }
  0xc3   :  { %v902_v9 = vsel %vm494_vm7, %v899_v0, %v901_v63  ;;  %v906_v14 = vsel %vm494_vm7, %v901_v63, %v899_v0  ;;  %v988_v26 = vld [vmem:[#allocation2 + $0x180] sm:$0xff] }
  0xc4   :  { %896 = vst [vmem:[#allocation2 + $0xb8] sm:$0xf0] %v892_v8  ;;  %897 = vst [vmem:[#allocation2 + $0x1b8] sm:$0xf0] %v893_v16  ;;  %v907_v19 = vmul.f32 %v902_v9, %v1632_v46  ;;  %v908_v37 = vmul.f32 %v906_v14, %v1636_v51  ;;  %v987_v51 = vld [vmem:[#allocation2 + $0x150] sm:$0xff] }
  0xc5   :  { %v992_v20 = vld [vmem:[#allocation2 + $0x188] sm:$0xff]  ;;  %v991_v38 = vld [vmem:[#allocation2 + $0xe0] sm:$0xff] }
  0xc6   :  { %909 = vst [vmem:[#allocation2 + $0x80] sm:$0xf] %v907_v19  ;;  %910 = vst [vmem:[#allocation2 + $0x110] sm:$0xf] %v908_v37  ;;  %v320_v21 = vpop.permute.xlu1 %319  ;;  %1043 = vmatprep.subr.mxu0 %v992_v20  ;;  %v317_v22 = vpop.permute.xlu0 %316 }
  0xc7   :  { %v322_v41 = vsel %vm321_vm12, %v320_v21, %v317_v22  ;;  %v325_v42 = vsel %vm321_vm12, %v317_v22, %v320_v21  ;;  %1044 = vmatpush1.msra.mxu0 %v991_v38 }
  0xc8   :  { %v334_v56 = vmul.f32 %v1391_v24, %v325_v42  ;;  %v335_v46 = vmul.f32 %v1395_v25, %v322_v41  ;;  %1045 = vmatprep.subr.mxu0 %v988_v26 }
  0xc9   :  { %1046 = vmatpush1.msra.mxu0 %v987_v51 }
  0xca   :  { %v338_v5 = vrot.slane %v334_v56, 4  ;;  %v339_v27 = vrot.slane %v335_v46, 4  ;;  %v850_v32 = vpop.permute.xlu1 %849  ;;  %v848_v3 = vpop.permute.xlu0 %847 }
  0xcb   :  { %v851_v47 = vsel %vm416_vm8, %v848_v3, %v850_v32  ;;  %v855_v48 = vsel %vm416_vm8, %v850_v32, %v848_v3 }
  0xcc   :  { %342 = vst [vmem:[#allocation2 + $0x50] sm:$0xf0] %v338_v5  ;;  %343 = vst [vmem:[#allocation2 + $0x1b0] sm:$0xf0] %v339_v27  ;;  %v856_v33 = vmul.f32 %v851_v47, %v1656_v43  ;;  %v857_v12 = vmul.f32 %v855_v48, %v1660_v44  ;;  %v1738_v44 = vrot.slane %v1361_v17, %v1452_v31 }
  0xcd   :  { %v1002_v13 = vld [vmem:[#allocation2 + $0x110] sm:$0xff]  ;;  %v1001_v45 = vld [vmem:[#allocation2 + $0x80] sm:$0xff]  ;;  %v1754_v31 = vrot.slane %v1366_v18, %v1512_v49 }
  0xce   :  { %v860_v39 = vrot.slane %v856_v33, 4  ;;  %v861_v40 = vrot.slane %v857_v12, 4  ;;  %v869_v52 = vpop.permute.xlu1 %868  ;;  %1110 = vmatprep.subr.mxu1 %v1002_v13  ;;  %v867_v53 = vpop.permute.xlu0 %866  ;;  %v1786_v13 = vrot.slane %v1366_v18, %v1542_v6 }
  0xcf   :  { %v870_v1 = vsel %vm444_vm9, %v867_v53, %v869_v52  ;;  %v874_v2 = vsel %vm444_vm9, %v869_v52, %v867_v53  ;;  %1111 = vmatpush1.msra.mxu1 %v1001_v45 }
  0xd0   :  { %864 = vst [vmem:[#allocation2 + $0x1e8] sm:$0xf0] %v860_v39  ;;  %865 = vst [vmem:[#allocation2 + $0xb0] sm:$0xf0] %v861_v40  ;;  %v875_v54 = vmul.f32 %v870_v1, %v1672_v23  ;;  %v876_v43 = vmul.f32 %v874_v2, %v1676_v4 }
  0xd2   :  { %877 = vst [vmem:[#allocation2 + $0xb8] sm:$0xf] %v875_v54  ;;  %878 = vst [vmem:[#allocation2 + $0x1b8] sm:$0xf] %v876_v43  ;;  %v270_v57 = vpop.permute.xlu1 %269  ;;  %v267_v58 = vpop.permute.xlu0 %266 }
  0xd3   :  { %v272_v59 = vsel %vm271_vm13, %v270_v57, %v267_v58  ;;  %v275_v60 = vsel %vm271_vm13, %v267_v58, %v270_v57 }
  0xd4   :  { %v284_v23 = vmul.f32 %v1738_v44, %v275_v60  ;;  %v285_v4 = vmul.f32 %v1742_v55, %v272_v59 }
  0xd6   :  { %v288_v62 = vrot.slane %v284_v23, 4  ;;  %v289_v7 = vrot.slane %v285_v4, 4  ;;  %v298_v15 = vpop.permute.xlu1 %297  ;;  %v295_v8 = vpop.permute.xlu0 %294 }
  0xd7   :  { %v300_v16 = vsel %vm299_vm14, %v298_v15, %v295_v8  ;;  %v303_v63 = vsel %vm299_vm14, %v295_v8, %v298_v15 }
  0xd8   :  { %292 = vst [vmem:[#allocation2 + $0x158] sm:$0xf0] %v288_v62  ;;  %293 = vst [vmem:[#allocation2 + $0xe8] sm:$0xf0] %v289_v7  ;;  %v312_v0 = vmul.f32 %v1750_v61, %v303_v63  ;;  %v313_v9 = vmul.f32 %v1754_v31, %v300_v16  ;;  %v1798_v62 = vrot.slane %v1441_v28, %v1455_v34 }
  0xd9   :  { %v998_v14 = vld [vmem:[#allocation2 + $0x1b8] sm:$0xff]  ;;  %v1802_v7 = vrot.slane %v1446_v29, %v1455_v34  ;;  %v1810_v34 = vrot.slane %v1441_v28, %v1515_v50 }
  0xda   :  { %v997_v19 = vld [vmem:[#allocation2 + $0xb8] sm:$0xff]  ;;  %314 = vst [vmem:[#allocation2 + $0x50] sm:$0xf] %v312_v0  ;;  %315 = vst [vmem:[#allocation2 + $0x1b0] sm:$0xf] %v313_v9  ;;  %v818_v49 = vpop.permute.xlu1 %817  ;;  %1112 = vmatprep.subr.mxu1 %v998_v14  ;;  %v816_v37 = vpop.permute.xlu0 %815 }
  0xdb   :  { %v819_v20 = vsel %vm366_vm10, %v816_v37, %v818_v49  ;;  %v823_v38 = vsel %vm366_vm10, %v818_v49, %v816_v37  ;;  %1113 = vmatpush1.msra.mxu1 %v997_v19  ;;  %v1814_v19 = vrot.slane %v1446_v29, %v1515_v50 }
  0xdc   :  { %v824_v21 = vmul.f32 %v819_v20, %v1694_v10  ;;  %v825_v22 = vmul.f32 %v823_v38, %v1698_v11  ;;  %v1770_v10 = vrot.slane %v1441_v28, %v1449_v30  ;;  %v1774_v11 = vrot.slane %v1446_v29, %v1449_v30 }
  0xdd   :  { %v1782_v30 = vrot.slane %v1361_v17, %v1542_v6 }
  0xde   :  { %v828_v41 = vrot.slane %v824_v21, 4  ;;  %v829_v42 = vrot.slane %v825_v22, 4  ;;  %v837_v26 = vpop.permute.xlu1 %836  ;;  %v835_v56 = vpop.permute.xlu0 %834 }
  0xdf   :  { %v838_v46 = vsel %vm394_vm11, %v835_v56, %v837_v26  ;;  %v842_v51 = vsel %vm394_vm11, %v837_v26, %v835_v56 }
  0xe0   :  { %832 = vst [vmem:[#allocation2 + $0x70] sm:$0xf0] %v828_v41  ;;  %833 = vst [vmem:[#allocation2 + $0x78] sm:$0xf0] %v829_v42  ;;  %v843_v5 = vmul.f32 %v838_v46, %v1706_v35  ;;  %v844_v27 = vmul.f32 %v842_v51, %v1710_v36 }
  0xe1   :  { %v984_v32 = vld [vmem:[#allocation2 + $0x1b0] sm:$0xff] }
  0xe2   :  { %v983_v3 = vld [vmem:[#allocation2 + $0x50] sm:$0xff]  ;;  %845 = vst [vmem:[#allocation2 + $0x1e8] sm:$0xf] %v843_v5  ;;  %846 = vst [vmem:[#allocation2 + $0xb0] sm:$0xf] %v844_v27  ;;  %v220_v47 = vpop.permute.xlu1 %219  ;;  %1047 = vmatprep.subr.mxu0 %v984_v32  ;;  %v217_v48 = vpop.permute.xlu0 %216 }
  0xe3   :  { %v222_v33 = vsel %vm221_vm15, %v220_v47, %v217_v48  ;;  %v225_v35 = vsel %vm221_vm15, %v217_v48, %v220_v47  ;;  %1048 = vmatpush1.msra.mxu0 %v983_v3 }
  0xe4   :  { %v234_v36 = vmul.f32 %v1770_v10, %v225_v35  ;;  %v235_v12 = vmul.f32 %v1774_v11, %v222_v33 }
  0xe6   :  { %v238_v45 = vrot.slane %v234_v36, 4  ;;  %v239_v39 = vrot.slane %v235_v12, 4  ;;  %v248_v40 = vpop.permute.xlu1 %247  ;;  %v245_v52 = vpop.permute.xlu0 %244 }
  0xe7   :  { %v250_v53 = vsel %vm249_vm0, %v248_v40, %v245_v52  ;;  %v253_v1 = vsel %vm249_vm0, %v245_v52, %v248_v40  ;;  %v990_v59 = vld [vmem:[#allocation2 + $0x78] sm:$0xff]  ;;  %v989_v4 = vld [vmem:[#allocation2 + $0x70] sm:$0xff] }
  0xe8   :  { %242 = vst [vmem:[#allocation2 + $0xf8] sm:$0xf0] %v238_v45  ;;  %243 = vst [vmem:[#allocation2 + $0x1a8] sm:$0xf0] %v239_v39  ;;  %v262_v2 = vmul.f32 %v1782_v30, %v253_v1  ;;  %v263_v54 = vmul.f32 %v1786_v13, %v250_v53 }
  0xe9   :  { %v994_v17 = vld [vmem:[#allocation2 + $0xb0] sm:$0xff]  ;;  %v993_v43 = vld [vmem:[#allocation2 + $0x1e8] sm:$0xff] }
  0xea   :  { %264 = vst [vmem:[#allocation2 + $0x158] sm:$0xf] %v262_v2  ;;  %265 = vst [vmem:[#allocation2 + $0xe8] sm:$0xf] %v263_v54  ;;  %v794_v18 = vpop.permute.xlu1 %793  ;;  %1114 = vmatprep.subr.mxu1 %v994_v17  ;;  %v791_v6 = vpop.permute.xlu0 %790 }
  0xeb   :  { %v795_v57 = vsel %vm321_vm12, %v794_v18, %v791_v6  ;;  %v798_v58 = vsel %vm321_vm12, %v791_v6, %v794_v18  ;;  %1115 = vmatpush1.msra.mxu1 %v993_v43  ;;  %v967_v43 = vld [vmem:[#allocation2 + $0x168] sm:$0xff] }
  0xec   :  { %v799_v60 = vmul.f32 %v798_v58, %v1391_v24  ;;  %v800_v23 = vmul.f32 %v795_v57, %v1395_v25  ;;  %1116 = vmatprep.subr.mxu1 %v990_v59  ;;  %v964_v57 = vld [vmem:[#allocation2 + $0x98] sm:$0xff]  ;;  %v963_v59 = vld [vmem:[#allocation2 + $0xc0] sm:$0xff] }
  0xed   :  { %1117 = vmatpush1.msra.mxu1 %v989_v4 }
  0xee   :  { %v803_v15 = vrot.slane %v799_v60, 4  ;;  %v804_v8 = vrot.slane %v800_v23, 4  ;;  %v170_v16 = vpop.permute.xlu1 %169 }
  0xef   :  { %v167_v63 = vpop.permute.xlu0 %166 }
  0xf0   :  { %807 = vst [vmem:[#allocation2 + $0x48] sm:$0xf0] %v803_v15  ;;  %808 = vst [vmem:[#allocation2 + $0x118] sm:$0xf0] %v804_v8  ;;  %v172_v24 = vsel %vm171_vm1, %v170_v16, %v167_v63  ;;  %v175_v25 = vsel %vm171_vm1, %v167_v63, %v170_v16 }
  0xf1   :  { %v184_v0 = vmul.f32 %v1798_v62, %v175_v25  ;;  %v185_v9 = vmul.f32 %v1802_v7, %v172_v24  ;;  %v980_v14 = vld [vmem:[#allocation2 + $0xe8] sm:$0xff]  ;;  %v979_v49 = vld [vmem:[#allocation2 + $0x158] sm:$0xff] }
  0xf2   :  { %v198_v37 = vpop.permute.xlu1 %197  ;;  %1049 = vmatprep.subr.mxu0 %v980_v14 }
  0xf3   :  { %v188_v20 = vrot.slane %v184_v0, 4  ;;  %v189_v38 = vrot.slane %v185_v9, 4  ;;  %v195_v21 = vpop.permute.xlu0 %194  ;;  %1050 = vmatpush1.msra.mxu0 %v979_v49 }
  0xf4   :  { %v200_v22 = vsel %vm199_vm2, %v198_v37, %v195_v21  ;;  %v203_v41 = vsel %vm199_vm2, %v195_v21, %v198_v37 }
  0xf5   :  { %192 = vst [vmem:[#allocation2] sm:$0xf0] %v188_v20  ;;  %193 = vst [vmem:[#allocation2 + $0xd8] sm:$0xf0] %v189_v38  ;;  %v212_v28 = vmul.f32 %v1810_v34, %v203_v41  ;;  %v213_v42 = vmul.f32 %v1814_v19, %v200_v22  ;;  %v970_v41 = vld [vmem:[#allocation2 + $0x1f8] sm:$0xff] }
  0xf6   :  { %v762_v26 = vpop.permute.xlu1 %761 }
  0xf7   :  { %214 = vst [vmem:[#allocation2 + $0xf8] sm:$0xf] %v212_v28  ;;  %215 = vst [vmem:[#allocation2 + $0x1a8] sm:$0xf] %v213_v42  ;;  %v759_v29 = vpop.permute.xlu0 %758  ;;  %v969_v28 = vld [vmem:[#allocation2 + $0xc8] sm:$0xff] }
  0xf8   :  { %v763_v50 = vsel %vm271_vm13, %v762_v26, %v759_v29  ;;  %v766_v56 = vsel %vm271_vm13, %v759_v29, %v762_v26 }
  0xf9   :  { %v767_v46 = vmul.f32 %v766_v56, %v1738_v44  ;;  %v768_v51 = vmul.f32 %v763_v50, %v1742_v55 }
  0xfb   :  { %v781_v5 = vpop.permute.xlu1 %780  ;;  %v771_v27 = vrot.slane %v767_v46, 4  ;;  %v772_v32 = vrot.slane %v768_v51, 4  ;;  %v778_v3 = vpop.permute.xlu0 %777 }
  0xfc   :  { %v782_v47 = vsel %vm299_vm14, %v781_v5, %v778_v3  ;;  %v785_v48 = vsel %vm299_vm14, %v778_v3, %v781_v5  ;;  %v972_v40 = vld [vmem:[#allocation2 + $0xd8] sm:$0xff] }
  0xfd   :  { %775 = vst [vmem:[#allocation2 + $0x68] sm:$0xf0] %v771_v27  ;;  %776 = vst [vmem:[#allocation2 + $0x8] sm:$0xf0] %v772_v32  ;;  %v786_v33 = vmul.f32 %v785_v48, %v1750_v61  ;;  %v787_v35 = vmul.f32 %v782_v47, %v1754_v31  ;;  %v971_v61 = vld [vmem:[#allocation2] sm:$0xff]  ;;  %v968_v31 = vld [vmem:[#allocation2 + $0x10] sm:$0xff] }
  0xfe   :  { %v976_v12 = vld [vmem:[#allocation2 + $0x1a8] sm:$0xff]  ;;  %v975_v45 = vld [vmem:[#allocation2 + $0xf8] sm:$0xff] }
  0xff   :  { %v730_v36 = vpop.permute.xlu1 %729  ;;  %788 = vst [vmem:[#allocation2 + $0x48] sm:$0xf] %v786_v33  ;;  %789 = vst [vmem:[#allocation2 + $0x118] sm:$0xf] %v787_v35  ;;  %1051 = vmatprep.subr.mxu0 %v976_v12  ;;  %v727_v44 = vpop.permute.xlu0 %726 }
 0x100   :  { %v731_v55 = vsel %vm221_vm15, %v730_v36, %v727_v44  ;;  %v734_v39 = vsel %vm221_vm15, %v727_v44, %v730_v36  ;;  %1052 = vmatpush1.msra.mxu0 %v975_v45 }
 0x101   :  { %v735_v52 = vmul.f32 %v734_v39, %v1770_v10  ;;  %v736_v53 = vmul.f32 %v731_v55, %v1774_v11  ;;  %1053 = vmatprep.subr.mxu0 %v972_v40  ;;  %v962_v10 = vld [vmem:[%s1865_s1] sm:$0xff] }
 0x102   :  { %1054 = vmatpush1.msra.mxu0 %v971_v61 }
 0x103   :  { %v739_v1 = vrot.slane %v735_v52, 4  ;;  %v740_v2 = vrot.slane %v736_v53, 4  ;;  %v749_v54 = vpop.permute.xlu1 %748  ;;  %1055 = vmatprep.subr.mxu0 %v968_v31  ;;  %v746_v17 = vpop.permute.xlu0 %745 }
 0x104   :  { %v750_v18 = vsel %vm249_vm0, %v749_v54, %v746_v17  ;;  %v753_v6 = vsel %vm249_vm0, %v746_v17, %v749_v54  ;;  %1056 = vmatpush1.msra.mxu0 %v967_v43 }
 0x105   :  { %743 = vst [vmem:[#allocation2 + $0x138] sm:$0xf0] %v739_v1  ;;  %744 = vst [vmem:[#allocation2 + $0xa0] sm:$0xf0] %v740_v2  ;;  %v754_v11 = vmul.f32 %v753_v6, %v1782_v30  ;;  %v755_v58 = vmul.f32 %v750_v18, %v1786_v13  ;;  %1057 = vmatprep.subr.mxu0 %v964_v57 }
 0x106   :  { %1058 = vmatpush1.msra.mxu0 %v963_v59  ;;  %v986_v60 = vld [vmem:[#allocation2 + $0x118] sm:$0xff]  ;;  %v985_v23 = vld [vmem:[#allocation2 + $0x48] sm:$0xff] }
 0x107   :  { %756 = vst [vmem:[#allocation2 + $0x68] sm:$0xf] %v754_v11  ;;  %757 = vst [vmem:[#allocation2 + $0x8] sm:$0xf] %v755_v58  ;;  %v698_v4 = vpop.permute.xlu1 %697  ;;  %1118 = vmatprep.subr.mxu1 %v986_v60  ;;  %v695_v15 = vpop.permute.xlu0 %694  ;;  %1092 = vmatmul.mubr.f32.vlgmr.msra.gmra.mxu0 %v962_v10 }
 0x108   :  { %v699_v8 = vsel %vm171_vm1, %v698_v4, %v695_v15  ;;  %v702_v16 = vsel %vm171_vm1, %v695_v15, %v698_v4  ;;  %1119 = vmatpush1.msra.mxu1 %v985_v23 }
 0x109   :  { %v703_v30 = vmul.f32 %v702_v16, %v1798_v62  ;;  %v704_v13 = vmul.f32 %v699_v8, %v1802_v7 }
 0x10b   :  { %v707_v63 = vrot.slane %v703_v30, 4  ;;  %v708_v24 = vrot.slane %v704_v13, 4  ;;  %v717_v25 = vpop.permute.xlu1 %716  ;;  %v714_v0 = vpop.permute.xlu0 %713 }
 0x10c   :  { %v718_v9 = vsel %vm199_vm2, %v717_v25, %v714_v0  ;;  %v721_v14 = vsel %vm199_vm2, %v714_v0, %v717_v25 }
 0x10d   :  { %711 = vst [vmem:[#allocation2 + $0x1f0] sm:$0xf0] %v707_v63  ;;  %712 = vst [vmem:[#allocation2 + $0x20] sm:$0xf0] %v708_v24  ;;  %v722_v49 = vmul.f32 %v721_v14, %v1810_v34  ;;  %v723_v37 = vmul.f32 %v718_v9, %v1814_v19  ;;  %v966_v34 = vld [vmem:[#allocation2 + $0x170] sm:$0xff] }
 0x10e   :  { %v982_v20 = vld [vmem:[#allocation2 + $0x8] sm:$0xff]  ;;  %v965_v19 = vld [vmem:[#allocation2 + $0xd0] sm:$0xff] }
 0x10f   :  { %v981_v38 = vld [vmem:[#allocation2 + $0x68] sm:$0xff]  ;;  %724 = vst [vmem:[#allocation2 + $0x138] sm:$0xf] %v722_v49  ;;  %725 = vst [vmem:[#allocation2 + $0xa0] sm:$0xf] %v723_v37  ;;  %1120 = vmatprep.subr.mxu1 %v982_v20 }
 0x110   :  { %1121 = vmatpush1.msra.mxu1 %v981_v38 }
 0x114   :  { %v974_v21 = vld [vmem:[#allocation2 + $0x20] sm:$0xff]  ;;  %v973_v22 = vld [vmem:[#allocation2 + $0x1f0] sm:$0xff] }
 0x116   :  { %v978_v62 = vld [vmem:[#allocation2 + $0xa0] sm:$0xff]  ;;  %v977_v7 = vld [vmem:[#allocation2 + $0x138] sm:$0xff] }
 0x117   :  { %1122 = vmatprep.subr.mxu1 %v978_v62 }
 0x118   :  { %1123 = vmatpush1.msra.mxu1 %v977_v7 }
 0x119   :  { %1124 = vmatprep.subr.mxu1 %v974_v21 }
 0x11a   :  { %1125 = vmatpush1.msra.mxu1 %v973_v22 }
 0x11b   :  { %1126 = vmatprep.subr.mxu1 %v970_v41 }
 0x11c   :  { %1127 = vmatpush1.msra.mxu1 %v969_v28 }
 0x11d   :  { %1128 = vmatprep.subr.mxu1 %v966_v34 }
 0x11e   :  { %1129 = vmatpush1.msra.mxu1 %v965_v19 }
 0x11f   :  { %1163 = vmatmul.mubr.f32.vlgmr.msra.gmra.mxu1 %v962_v10 }
 0x1c7   :  { %v1093_v42 = vpop.f32.mrf.mxu0 }
 0x1c8   :  { %1169 = vst [vmem:[%s1866_s3] sm:$0xff] %v1093_v42  ;;  %v1178_v29 = vmul.f32 %v1093_v42, %v1093_v42 }
 0x1c9   :  { %v1095_v26 = vpop.f32.mrf.mxu0 }
 0x1ca   :  { %1170 = vst [vmem:[%s1866_s3 + $0x8] sm:$0xff] %v1095_v26  ;;  %v1179_v50 = vmul.f32 %v1095_v26, %v1095_v26  ;;  %v1173_v56 = vadd.f32 %v1095_v26, %v1093_v42 }
 0x1cc   :  { %v1182_v51 = vadd.f32 %v1179_v50, %v1178_v29 }
 0x1df   :  { %v1164_v46 = vpop.f32.mrf.mxu1 }
 0x1e0   :  { %1171 = vst [vmem:[%s1866_s3 + $0x10] sm:$0xff] %v1164_v46  ;;  %v1180_v5 = vmul.f32 %v1164_v46, %v1164_v46  ;;  %v1174_v27 = vadd.f32 %v1173_v56, %v1164_v46 }
 0x1e1   :  { %v1166_v32 = vpop.f32.mrf.mxu1 }
 0x1e2   :  { %1172 = vst [vmem:[%s1866_s3 + $0x18] sm:$0xff] %v1166_v32  ;;  %v1181_v3 = vmul.f32 %v1166_v32, %v1166_v32  ;;  %v1175_v47 = vadd.f32 %v1174_v27, %v1166_v32  ;;  %v1183_v48 = vadd.f32 %v1182_v51, %v1180_v5 }
 0x1e4   :  { %1176 = vadd.xlane.f32.xlu0 %v1175_v47  ;;  %v1184_v33 = vadd.f32 %v1183_v48, %v1181_v3 }
 0x1e6   :  { %1185 = vadd.xlane.f32.xlu1 %v1184_v33 }
 0x26d   :  { %v1177_v35 = vpop.xlane.xlu0 %1176 }
 0x26f   :  { %v1186_v36 = vpop.xlane.xlu1 %1185 }
 0x270   :  { %v1188_v12 = vsel %vm1187_vm3, %v1177_v35, %v1186_v36 }
 0x271   :  { %1189 = vst.msk [vmem:[%s1867_s4] sm:$0xff] %vm321_vm12, %v1188_v12 }

</bundles_post_ra>
